<compile_context>
chip_gen: v7x
topology: tpu7x:2x2x1
jax: 0.10.0
libtpu: 0.0.40
codegen_flags: <defaults>
</compile_context>

<pallas_src>
import functools
import math

import jax
import jax.numpy as jnp
import numpy as np
from jax.experimental import pallas as pl
from jax.experimental.pallas import tpu as pltpu


# --------------------------------------------------------------------------
# Packed-parameter slab layout (every segment starts on a 128-lane boundary).
# --------------------------------------------------------------------------
def _pad128(n):
    return ((n + 127) // 128) * 128


def _slab_layout(H):
    w3, w1, w2 = _pad128(3 * H), _pad128(H), _pad128(2 * H)
    return dict(
        # ---- weight slab [H, w_total] (bf16) ------------------------------
        gru_w=(0, 3 * w3),                    # fused [W_ci|0|W_co|0|W_hh|0]
        ci=(0, 3 * H),
        co=(w3, w3 + 3 * H),
        hh=(2 * w3, 2 * w3 + 3 * H),
        q1=(3 * w3, 3 * w3 + H),
        q2=(3 * w3 + w1, 3 * w3 + w1 + H),
        k12=(3 * w3 + 2 * w1, 3 * w3 + 2 * w1 + 2 * H),
        w_total=3 * w3 + 2 * w1 + w2,
        # ---- bias slab [1, b_total] (f32) ----------------------------------
        b_gru=(0, 3 * w3),                    # [b_ci|0|b_co|0|b_hh|0]
        b_gi=(3 * w3, 3 * w3 + 3 * H),
        b_q1=(4 * w3, 4 * w3 + H),
        b_q2=(4 * w3 + H, 4 * w3 + 2 * H),
        b_k12=(4 * w3 + 2 * H, 4 * w3 + 4 * H),
        b_g=(4 * w3 + 4 * H, 4 * w3 + 5 * H),
        b_total=4 * w3 + _pad128(5 * H),
    )


# --------------------------------------------------------------------------
# Pallas kernel: TB sessions per grid step.
# --------------------------------------------------------------------------
def _star_gnn_kernel(step, H, N, TB, lay, approx_recip,
                     bd_ref, h_ref, cnt_ref, w_ref, b_ref, wg_ref,
                     hout_ref, sout_ref, hw_scr):
    f32, bf16 = jnp.float32, jnp.bfloat16
    inv_sqrt_h = 1.0 / math.sqrt(H)
    R, H3 = TB * N, 3 * H

    def recip(x):
        return pl.reciprocal(x, approx=True) if approx_recip else 1.0 / x

    def mmf(x_bf, w_bf):
        # bf16 MXU matmul with f32 accumulation.
        return jnp.dot(x_bf, w_bf, preferred_element_type=f32)

    def wsl(key):
        lo, hi = lay[key]
        return w_ref[:, lo:hi]

    def bsl(key):
        lo, hi = lay[key]
        return b_ref[:, lo:hi]

    # ---- parameters (loaded once; every slice starts 128-lane aligned) -----
    w_gru = wsl("gru_w")                       # [H, 3*pad128(3H)] bf16
    w_q1, w_q2, w_k12 = wsl("q1"), wsl("q2"), wsl("k12")
    wg = wg_ref[...]                           # [2H, H] bf16
    b_gru = bsl("b_gru")                       # [1, 3*pad128(3H)] f32
    b_gi, b_q1, b_q2 = bsl("b_gi"), bsl("b_q1"), bsl("b_q2")
    b_k12, b_g = bsl("b_k12"), bsl("b_g")

    ci_lo, _ = lay["ci"]
    co_lo, _ = lay["co"]
    hh_lo, _ = lay["hh"]

    # ---- inputs -------------------------------------------------------------
    bd = bd_ref[0]                             # [R, 2R] bf16 block-diag adjacency
    h0_3 = h_ref[...]                          # [TB, N, H] f32
    h0_flat = h0_3.reshape(R, H)
    cnt = cnt_ref[...]                         # [TB, 1]  f32 (= sum(mask)+1e-6)

    # star node init: mean of hidden over valid positions.
    s0 = jnp.sum(h0_3, axis=1) * recip(cnt)    # [TB, H]

    def one_step(h_flat, s):
        h_bf = h_flat.astype(bf16)
        # ------- GNNCell: one fused per-node matmul ([t_in | t_out | gh]) ----
        tmp = mmf(h_bf, w_gru) + b_gru                          # [R, 3*pad]
        t_in = tmp[:, ci_lo:ci_lo + H3]                         # [R, 3H]
        t_out = tmp[:, co_lo:co_lo + H3]                        # [R, 3H]
        gh = tmp[:, hh_lo:hh_lo + H3]                           # [R, 3H]

        # Graph message passing as ONE block-diagonal matmul (K = 2R).
        t_stack = jnp.concatenate([t_in, t_out], axis=0).astype(bf16)  # [2R,3H]
        gi = mmf(bd, t_stack) + b_gi                            # [R, 3H]

        resetgate = jax.nn.sigmoid(gi[:, :H] + gh[:, :H])
        inputgate = jax.nn.sigmoid(gi[:, H:2 * H] + gh[:, H:2 * H])
        newgate = jnp.tanh(gi[:, 2 * H:H3] + resetgate * gh[:, 2 * H:H3])
        h1 = newgate + inputgate * (h_flat - newgate)           # [R, H]

        # ------- star-node attention (alpha) ---------------------------------
        k12 = mmf(s.astype(bf16), w_k12) + b_k12                # [TB, 2H]
        k1, k2 = k12[:, :H], k12[:, H:2 * H]

        q1 = mmf(h1.astype(bf16), w_q1) + b_q1                  # [R, H]
        logits = jnp.sum(q1.reshape(TB, N, H) * k1[:, None, :],
                         axis=2, keepdims=True) * inv_sqrt_h    # [TB, N, 1]
        logits = logits - jnp.max(logits, axis=1, keepdims=True)
        e = jnp.exp(logits)
        alpha = e * recip(jnp.sum(e, axis=1, keepdims=True))
        h_3 = (1.0 - alpha) * h1.reshape(TB, N, H) + alpha * s[:, None, :]
        h_new = h_3.reshape(R, H)

        # ------- star-node update (beta) --------------------------------------
        q2 = mmf(h_new.astype(bf16), w_q2) + b_q2               # [R, H]
        logits2 = jnp.sum(q2.reshape(TB, N, H) * k2[:, None, :],
                          axis=2, keepdims=True) * inv_sqrt_h
        logits2 = logits2 - jnp.max(logits2, axis=1, keepdims=True)
        e2 = jnp.exp(logits2)
        beta = e2 * recip(jnp.sum(e2, axis=1, keepdims=True))
        s_new = jnp.sum(beta * h_3, axis=1)                     # [TB, H]
        return h_new, s_new

    if step == 1:
        h_flat, s = one_step(h0_flat, s0)
    else:
        # fori_loop keeps live ranges bounded for step >= 2 (no full unroll).
        h_flat, s = jax.lax.fori_loop(0, step, lambda _, c: one_step(*c),
                                      (h0_flat, s0))

    # ---- highway gate: one fused [R, 2H] @ [2H, H] matmul --------------------
    hw_scr[:, :H] = h0_flat
    hw_scr[:, H:2 * H] = h_flat
    g = jax.nn.sigmoid(mmf(hw_scr[...].astype(bf16), wg) + b_g)
    h_final = g * h0_flat + (1.0 - g) * h_flat

    hout_ref[...] = h_final.reshape(TB, N, H).astype(hout_ref.dtype)
    sout_ref[...] = s.reshape(TB, 1, H).astype(sout_ref.dtype)


# --------------------------------------------------------------------------
# Generation-aware sizing.
# --------------------------------------------------------------------------
def _tpu_generation_info():
    """(vmem_capacity_bytes, tensorcores_per_chip) with safe fallbacks."""
    vmem_cap = 128 * 1024 * 1024
    try:
        info = pltpu.get_tpu_info()
        for attr in ("vmem_capacity_bytes", "vmem_bytes", "vmem_size_bytes"):
            v = getattr(info, attr, None)
            if v:
                vmem_cap = int(v)
                break
    except Exception:
        pass
    # 64 MiB-VMEM parts (v7x) have 2 TensorCores/chip; 128 MiB parts have 1.
    n_cores = 2 if vmem_cap <= 64 * 1024 * 1024 else 1
    return vmem_cap, n_cores


def _choose_batch_tile(B, N, H, vmem_cap, n_cores, max_batch_tile=None):
    """v5e/v6e (1 TC): maximize TB.  v7x (2 TC): cap TB so grid >= 2."""
    vmem_limit = max(16 * 1024 * 1024, min(vmem_cap // 2, 48 * 1024 * 1024))
    budget = int(0.7 * vmem_limit)
    lay = _slab_layout(H)

    def vmem_bytes(tb):
        r = tb * N
        bd = r * 2 * r * 2                           # block-diag adjacency (bf16)
        io = tb * N * H * 4 * 2 + tb * H * 4 + tb * 4
        live = 8 * r * lay["gru_w"][1] * 4           # rough f32 intermediates
        params = H * lay["w_total"] * 2 + lay["b_total"] * 4 + 2 * H * H * 2
        return 2 * (bd + io) + params + live         # x2: double-buffered blocks

    cap = B if max_batch_tile is None else min(B, max_batch_tile)
    if n_cores > 1:
        cap = min(cap, max(1, B // n_cores))         # grid >= n_cores on v7x
    best, found = B, False
    for tb in range(1, cap + 1):
        if B % tb != 0:
            continue
        if tb % 8 != 0 and tb != B:
            continue                                 # keep the (TB, 1) cnt block legal
        if vmem_bytes(tb) <= budget:
            best, found = tb, True
    if not found:
        best = B
    return best, vmem_limit


# --------------------------------------------------------------------------
# Wrapper: block-diag adjacency + pallas_call plumbing.
# --------------------------------------------------------------------------
def star_gnn_forward(params, A, hidden, mask, *, step=1, max_batch_tile=None,
                     approx_reciprocal=True):
    B, N, H = hidden.shape
    assert A.shape == (B, N, 2 * N)
    out_dtype = hidden.dtype
    lay = _slab_layout(H)

    vmem_cap, n_cores = _tpu_generation_info()
    TB, vmem_limit = _choose_batch_tile(B, N, H, vmem_cap, n_cores,
                                        max_batch_tile)
    G, R = B // TB, TB * N

    # Block-diagonal adjacency per batch tile, [G, R, 2R] bf16: columns [0, R)
    # hold the in-edges, [R, 2R) the out-edges, so graph message passing is a
    # single lane-dense [R, 2R] @ [2R, 3H] MXU matmul inside the kernel.
    a_in = A[:, :, :N].reshape(G, TB, N, N).astype(jnp.float32)
    a_out = A[:, :, N:2 * N].reshape(G, TB, N, N).astype(jnp.float32)
    eye = jnp.eye(TB, dtype=jnp.float32)
    bd_in = jnp.einsum("gbnm,bc->gbncm", a_in, eye).reshape(G, R, R)
    bd_out = jnp.einsum("gbnm,bc->gbncm", a_out, eye).reshape(G, R, R)
    bd = jnp.concatenate([bd_in, bd_out], axis=-1).astype(jnp.bfloat16)

    hidden_f32 = hidden.astype(jnp.float32)
    cnt = jnp.sum(mask.astype(jnp.float32), axis=1, keepdims=True) + 1e-6  # [B,1]

    kernel = functools.partial(_star_gnn_kernel, step, H, N, TB, lay,
                               approx_reciprocal)
    in_specs = [
        pl.BlockSpec((1, R, 2 * R), lambda b: (b, 0, 0)),        # block-diag A
        pl.BlockSpec((TB, N, H), lambda b: (b, 0, 0)),           # hidden
        pl.BlockSpec((TB, 1), lambda b: (b, 0)),                 # mask count
        pl.BlockSpec((H, lay["w_total"]), lambda b: (0, 0)),     # weight slab
        pl.BlockSpec((1, lay["b_total"]), lambda b: (0, 0)),     # bias slab
        pl.BlockSpec((2 * H, H), lambda b: (0, 0)),              # highway weight
    ]
    out_specs = (
        pl.BlockSpec((TB, N, H), lambda b: (b, 0, 0)),
        pl.BlockSpec((TB, 1, H), lambda b: (b, 0, 0)),
    )
    out_shape = (
        jax.ShapeDtypeStruct((B, N, H), out_dtype),
        jax.ShapeDtypeStruct((B, 1, H), out_dtype),
    )
    return pl.pallas_call(
        kernel,
        out_shape=out_shape,
        grid_spec=pltpu.PrefetchScalarGridSpec(
            num_scalar_prefetch=0,
            grid=(G,),
            in_specs=in_specs,
            out_specs=out_specs,
            scratch_shapes=[pltpu.VMEM((R, 2 * H), jnp.float32)],
        ),
        compiler_params=pltpu.CompilerParams(
            dimension_semantics=("parallel",),
            vmem_limit_bytes=vmem_limit,
        ),
    )(bd, hidden_f32, cnt, params["w_all"], params["b_all"], params["wg"])


# --------------------------------------------------------------------------
# Parameter construction (raw == PyTorch layout; fused + aligned packing).
# --------------------------------------------------------------------------
def pack_params(raw, H):
    lay = _slab_layout(H)
    w_ih_T = np.asarray(raw["w_ih"]).T                   # [2H, 3H]
    W_in_T, W_out_T = w_ih_T[:H], w_ih_T[H:]
    W_hh_T = np.asarray(raw["w_hh"]).T                   # [H, 3H]
    Wg_T = np.asarray(raw["Wg"]).T                        # [2H, H]

    # Fold the edge linears into the GRU input weights (exact algebra):
    #   (A @ (h W_e^T + b_e) + b_ah) @ W_ih^T
    #     == A @ (h (W_e^T W_ih^T) + b_e W_ih^T) + b_ah W_ih^T
    W_ci = np.asarray(raw["W_ein"]).T @ W_in_T            # [H, 3H]
    W_co = np.asarray(raw["W_eout"]).T @ W_out_T          # [H, 3H]
    b_ci = np.asarray(raw["be_in"]) @ W_in_T
    b_co = np.asarray(raw["be_out"]) @ W_out_T
    b_gi = (np.asarray(raw["b_iah"]) @ W_in_T +
            np.asarray(raw["b_oah"]) @ W_out_T + np.asarray(raw["b_ih"]))

    w_all = np.zeros((H, lay["w_total"]), np.float32)
    b_all = np.zeros((1, lay["b_total"]), np.float32)

    def put_w(key, mat):
        lo, hi = lay[key]
        w_all[:, lo:hi] = np.asarray(mat)

    def put_b(key, vec):
        lo, hi = lay[key]
        b_all[0, lo:hi] = np.asarray(vec)

    put_w("ci", W_ci)
    put_w("co", W_co)
    put_w("hh", W_hh_T)
    put_w("q1", np.asarray(raw["Wq1"]).T)
    put_w("q2", np.asarray(raw["Wq2"]).T)
    put_w("k12", np.concatenate([np.asarray(raw["Wk1"]).T,
                                 np.asarray(raw["Wk2"]).T], axis=1))
    # GRU bias row matches the fused matmul output layout exactly.
    put_b("ci", b_ci)
    put_b("co", b_co)
    put_b("hh", np.asarray(raw["b_hh"]))
    put_b("b_gi", b_gi)
    put_b("b_q1", np.asarray(raw["bq1"]))
    put_b("b_q2", np.asarray(raw["bq2"]))
    put_b("b_k12", np.concatenate([np.asarray(raw["bk1"]),
                                   np.asarray(raw["bk2"])]))
    put_b("b_g", np.asarray(raw["bg"]))

    return dict(
        w_all=jnp.asarray(w_all).astype(jnp.bfloat16),
        b_all=jnp.asarray(b_all),
        wg=jnp.asarray(Wg_T).astype(jnp.bfloat16),
    )


def init_params(key, H):
    stdv = 1.0 / math.sqrt(H)
    keys = iter(jax.random.split(key, 24))

    def u(shape):
        return jax.random.uniform(next(keys), shape, jnp.float32, -stdv, stdv)

    raw = dict(
        w_ih=u((3 * H, 2 * H)), w_hh=u((3 * H, H)),
        b_ih=u((3 * H,)), b_hh=u((3 * H,)),
        b_iah=u((H,)), b_oah=u((H,)),
        W_ein=u((H, H)), be_in=u((H,)),
        W_eout=u((H, H)), be_out=u((H,)),
        Wq1=u((H, H)), bq1=u((H,)),
        Wk1=u((H, H)), bk1=u((H,)),
        Wq2=u((H, H)), bq2=u((H,)),
        Wk2=u((H, H)), bk2=u((H,)),
        Wg=u((H, 2 * H)), bg=u((H,)),
    )
    # NOTE: linear_edge_f is declared in the PyTorch __init__ but never used
    # in forward(), so it carries no kernel-side parameters.
    return raw, pack_params(raw, H)


# --------------------------------------------------------------------------
# Plain-JAX reference mirroring the PyTorch forward (for validation).
# --------------------------------------------------------------------------
def star_gnn_reference(raw, A, hidden, mask, *, step=1):
    H = hidden.shape[-1]
    N = A.shape[1]

    def linear(x, W, b):
        return x @ W.T + b

    s = jnp.sum(hidden, axis=1) / (jnp.sum(mask, axis=1) + 1e-6)[:, None]
    s = s[:, None, :]
    hidden0 = hidden
    for _ in range(step):
        ein = linear(hidden, raw["W_ein"], raw["be_in"])
        eout = linear(hidden, raw["W_eout"], raw["be_out"])
        input_in = jnp.matmul(A[:, :, :N], ein) + raw["b_iah"]
        input_out = jnp.matmul(A[:, :, N:2 * N], eout) + raw["b_oah"]
        inputs = jnp.concatenate([input_in, input_out], axis=2)
        gi = inputs @ raw["w_ih"].T + raw["b_ih"]
        gh = hidden @ raw["w_hh"].T + raw["b_hh"]
        i_r, i_i, i_n = jnp.split(gi, 3, axis=2)
        h_r, h_i, h_n = jnp.split(gh, 3, axis=2)
        resetgate = jax.nn.sigmoid(i_r + h_r)
        inputgate = jax.nn.sigmoid(i_i + h_i)
        newgate = jnp.tanh(i_n + resetgate * h_n)
        hidden1 = newgate + inputgate * (hidden - newgate)

        alpha = jnp.matmul(linear(hidden1, raw["Wq1"], raw["bq1"]),
                           jnp.transpose(linear(s, raw["Wk1"], raw["bk1"]),
                                         (0, 2, 1))) / math.sqrt(H)
        alpha = jax.nn.softmax(alpha, axis=1)
        hidden = (1 - alpha) * hidden1 + alpha * s
        beta = jnp.matmul(linear(hidden, raw["Wq2"], raw["bq2"]),
                          jnp.transpose(linear(s, raw["Wk2"], raw["bk2"]),
                                        (0, 2, 1))) / math.sqrt(H)
        beta = jax.nn.softmax(beta, axis=1)
        s = jnp.sum(beta * hidden, axis=1, keepdims=True)

    g = jax.nn.sigmoid(linear(jnp.concatenate([hidden0, hidden], axis=-1),
                              raw["Wg"], raw["bg"]))
    hidden = g * hidden0 + (1 - g) * hidden
    return hidden, s


if __name__ == "__main__":
    B, N, H = 16, 8, 32
    key = jax.random.PRNGKey(0)
    kp, ka, kh = jax.random.split(key, 3)

    raw, params = init_params(kp, H)
    A = jax.random.uniform(ka, (B, N, 2 * N), jnp.float32)
    hidden = jax.random.normal(kh, (B, N, H), jnp.float32)
    lengths = (jnp.arange(B) % N) + 1
    mask = (jnp.arange(N)[None, :] < lengths[:, None]).astype(jnp.float32)

    # max_batch_tile=8 -> TB=8, grid=(2,): exercises batching + the grid.
    # step=1 validates the unrolled path; step=2 validates the fori_loop path.
    for step, tol in ((1, 2e-2), (2, 5e-2)):
        h_out, s_out = jax.block_until_ready(
            star_gnn_forward(params, A, hidden, mask, step=step,
                             max_batch_tile=8))
        h_ref, s_ref = star_gnn_reference(raw, A, hidden, mask, step=step)
        np.testing.assert_allclose(np.asarray(h_out), np.asarray(h_ref),
                                   atol=tol, rtol=tol)
        np.testing.assert_allclose(np.asarray(s_out), np.asarray(s_ref),
                                   atol=tol, rtol=tol)
        assert not np.any(np.isnan(np.asarray(h_out)))
        assert not np.any(np.isnan(np.asarray(s_out)))
    print("KERNEL_OK")
</pallas_src>

<mosaic_0001>
module attributes {stable_mosaic.version = 11 : i64} {
  func.func @_star_gnn_kernel(%arg0: i32, %arg1: memref<1x64x128xbf16, #tpu.memory_space<vmem>>, %arg2: memref<8x8x32xf32, #tpu.memory_space<vmem>>, %arg3: memref<8x1xf32, #tpu.memory_space<vmem>>, %arg4: memref<32x768xbf16, #tpu.memory_space<vmem>>, %arg5: memref<1x768xf32, #tpu.memory_space<vmem>>, %arg6: memref<64x32xbf16, #tpu.memory_space<vmem>>, %arg7: memref<8x8x32xf32, #tpu.memory_space<vmem>>, %arg8: memref<8x1x32xf32, #tpu.memory_space<vmem>>, %arg9: memref<64x64xf32, #tpu.memory_space<vmem>>) attributes {dimension_semantics = [#tpu.dimension_semantics<parallel>], iteration_bounds = array<i64: 2>, scalar_prefetch = 0 : i64, scratch_operands = 1 : i64, tpu.core_type = #tpu.core_type<tc>, window_params = [{transform_indices = @transform_0, window_bounds = array<i64: 1, 64, 128>}, {transform_indices = @transform_1, window_bounds = array<i64: 8, 8, 32>}, {transform_indices = @transform_2, window_bounds = array<i64: 8, 1>}, {pipeline_mode = #tpu.pipeline_mode<synchronous>, transform_indices = @transform_3, window_bounds = array<i64: 32, 768>}, {pipeline_mode = #tpu.pipeline_mode<synchronous>, transform_indices = @transform_4, window_bounds = array<i64: 1, 768>}, {pipeline_mode = #tpu.pipeline_mode<synchronous>, transform_indices = @transform_5, window_bounds = array<i64: 64, 32>}, {transform_indices = @transform_6, window_bounds = array<i64: 8, 8, 32>}, {transform_indices = @transform_7, window_bounds = array<i64: 8, 1, 32>}]} {
    %c0 = arith.constant 0 : index
    %c0_0 = arith.constant 0 : index
    %0 = vector.load %arg4[%c0, %c0_0] : memref<32x768xbf16, #tpu.memory_space<vmem>>, vector<32x384xbf16>
    %c0_1 = arith.constant 0 : index
    %c384 = arith.constant 384 : index
    %1 = vector.load %arg4[%c0_1, %c384] : memref<32x768xbf16, #tpu.memory_space<vmem>>, vector<32x32xbf16>
    %c0_2 = arith.constant 0 : index
    %c512 = arith.constant 512 : index
    %2 = vector.load %arg4[%c0_2, %c512] : memref<32x768xbf16, #tpu.memory_space<vmem>>, vector<32x32xbf16>
    %c0_3 = arith.constant 0 : index
    %c640 = arith.constant 640 : index
    %3 = vector.load %arg4[%c0_3, %c640] : memref<32x768xbf16, #tpu.memory_space<vmem>>, vector<32x64xbf16>
    %c0_4 = arith.constant 0 : index
    %c0_5 = arith.constant 0 : index
    %4 = vector.load %arg6[%c0_4, %c0_5] : memref<64x32xbf16, #tpu.memory_space<vmem>>, vector<64x32xbf16>
    %c0_6 = arith.constant 0 : index
    %c0_7 = arith.constant 0 : index
    %5 = vector.load %arg5[%c0_6, %c0_7] : memref<1x768xf32, #tpu.memory_space<vmem>>, vector<1x384xf32>
    %c0_8 = arith.constant 0 : index
    %c384_9 = arith.constant 384 : index
    %6 = vector.load %arg5[%c0_8, %c384_9] : memref<1x768xf32, #tpu.memory_space<vmem>>, vector<1x96xf32>
    %c0_10 = arith.constant 0 : index
    %c512_11 = arith.constant 512 : index
    %7 = vector.load %arg5[%c0_10, %c512_11] : memref<1x768xf32, #tpu.memory_space<vmem>>, vector<1x32xf32>
    %c0_12 = arith.constant 0 : index
    %c544 = arith.constant 544 : index
    %8 = vector.load %arg5[%c0_12, %c544] : memref<1x768xf32, #tpu.memory_space<vmem>>, vector<1x32xf32>
    %c0_13 = arith.constant 0 : index
    %c576 = arith.constant 576 : index
    %9 = vector.load %arg5[%c0_13, %c576] : memref<1x768xf32, #tpu.memory_space<vmem>>, vector<1x64xf32>
    %c0_14 = arith.constant 0 : index
    %c640_15 = arith.constant 640 : index
    %10 = vector.load %arg5[%c0_14, %c640_15] : memref<1x768xf32, #tpu.memory_space<vmem>>, vector<1x32xf32>
    %c0_16 = arith.constant 0 : index
    %c0_17 = arith.constant 0 : index
    %c0_18 = arith.constant 0 : index
    %11 = vector.load %arg1[%c0_16, %c0_17, %c0_18] : memref<1x64x128xbf16, #tpu.memory_space<vmem>>, vector<1x64x128xbf16>
    %12 = vector.shape_cast %11 : vector<1x64x128xbf16> to vector<64x128xbf16>
    %c0_19 = arith.constant 0 : index
    %c0_20 = arith.constant 0 : index
    %c0_21 = arith.constant 0 : index
    %13 = vector.load %arg2[%c0_19, %c0_20, %c0_21] : memref<8x8x32xf32, #tpu.memory_space<vmem>>, vector<8x8x32xf32>
    %14 = vector.shape_cast %13 : vector<8x8x32xf32> to vector<64x32xf32>
    %c0_22 = arith.constant 0 : index
    %c0_23 = arith.constant 0 : index
    %15 = vector.load %arg3[%c0_22, %c0_23] : memref<8x1xf32, #tpu.memory_space<vmem>>, vector<8x1xf32>
    %cst = arith.constant dense<0.000000e+00> : vector<8x32xf32>
    %16 = vector.multi_reduction <add>, %13, %cst [1] : vector<8x8x32xf32> to vector<8x32xf32>
    %17 = tpu.reciprocal %15 {approx = true} : vector<8x1xf32> -> vector<8x1xf32>
    %18 = vector.broadcast %17 : vector<8x1xf32> to vector<8x32xf32>
    %19 = arith.mulf %16, %18 : vector<8x32xf32>
    %20 = arith.truncf %14 : vector<64x32xf32> to vector<64x32xbf16>
    %cst_24 = arith.constant dense<0.000000e+00> : vector<64x384xf32>
    %21 = tpu.matmul %20, %0, %cst_24 {dimension_numbers = #tpu.dot_dimension_numbers<[1], [0], [0], [1], [0, 0, 1, 1], [], []>} : vector<64x32xbf16>, vector<32x384xbf16>, vector<64x384xf32> -> vector<64x384xf32>
    %22 = vector.broadcast %5 : vector<1x384xf32> to vector<64x384xf32>
    %23 = arith.addf %21, %22 : vector<64x384xf32>
    %24 = vector.extract_strided_slice %23 {offsets = [0, 0], sizes = [64, 96], strides = [1, 1]} : vector<64x384xf32> to vector<64x96xf32>
    %25 = vector.extract_strided_slice %23 {offsets = [0, 128], sizes = [64, 96], strides = [1, 1]} : vector<64x384xf32> to vector<64x96xf32>
    %26 = vector.extract_strided_slice %23 {offsets = [0, 256], sizes = [64, 96], strides = [1, 1]} : vector<64x384xf32> to vector<64x96xf32>
    %27 = tpu.concatenate %24, %25 in 0 : vector<64x96xf32>, vector<64x96xf32> -> vector<128x96xf32>
    %28 = arith.truncf %27 : vector<128x96xf32> to vector<128x96xbf16>
    %cst_25 = arith.constant dense<0.000000e+00> : vector<64x96xf32>
    %29 = tpu.matmul %12, %28, %cst_25 {dimension_numbers = #tpu.dot_dimension_numbers<[1], [0], [0], [1], [0, 0, 1, 1], [], []>} : vector<64x128xbf16>, vector<128x96xbf16>, vector<64x96xf32> -> vector<64x96xf32>
    %30 = vector.broadcast %6 : vector<1x96xf32> to vector<64x96xf32>
    %31 = arith.addf %29, %30 : vector<64x96xf32>
    %32 = vector.extract_strided_slice %31 {offsets = [0, 0], sizes = [64, 32], strides = [1, 1]} : vector<64x96xf32> to vector<64x32xf32>
    %33 = vector.extract_strided_slice %26 {offsets = [0, 0], sizes = [64, 32], strides = [1, 1]} : vector<64x96xf32> to vector<64x32xf32>
    %34 = arith.addf %32, %33 : vector<64x32xf32>
    %35 = arith.negf %34 : vector<64x32xf32>
    %36 = math.exp %35 : vector<64x32xf32>
    %cst_26 = arith.constant 1.000000e+00 : f32
    %37 = vector.broadcast %cst_26 : f32 to vector<64x32xf32>
    %38 = arith.addf %37, %36 : vector<64x32xf32>
    %39 = arith.divf %37, %38 : vector<64x32xf32>
    %40 = vector.extract_strided_slice %31 {offsets = [0, 32], sizes = [64, 32], strides = [1, 1]} : vector<64x96xf32> to vector<64x32xf32>
    %41 = vector.extract_strided_slice %26 {offsets = [0, 32], sizes = [64, 32], strides = [1, 1]} : vector<64x96xf32> to vector<64x32xf32>
    %42 = arith.addf %40, %41 : vector<64x32xf32>
    %43 = arith.negf %42 : vector<64x32xf32>
    %44 = math.exp %43 : vector<64x32xf32>
    %cst_27 = arith.constant 1.000000e+00 : f32
    %45 = vector.broadcast %cst_27 : f32 to vector<64x32xf32>
    %46 = arith.addf %45, %44 : vector<64x32xf32>
    %47 = arith.divf %45, %46 : vector<64x32xf32>
    %48 = vector.extract_strided_slice %31 {offsets = [0, 64], sizes = [64, 32], strides = [1, 1]} : vector<64x96xf32> to vector<64x32xf32>
    %49 = vector.extract_strided_slice %26 {offsets = [0, 64], sizes = [64, 32], strides = [1, 1]} : vector<64x96xf32> to vector<64x32xf32>
    %50 = arith.mulf %39, %49 : vector<64x32xf32>
    %51 = arith.addf %48, %50 : vector<64x32xf32>
    %52 = math.tanh %51 : vector<64x32xf32>
    %53 = arith.subf %14, %52 : vector<64x32xf32>
    %54 = arith.mulf %47, %53 : vector<64x32xf32>
    %55 = arith.addf %52, %54 : vector<64x32xf32>
    %56 = arith.truncf %19 : vector<8x32xf32> to vector<8x32xbf16>
    %cst_28 = arith.constant dense<0.000000e+00> : vector<8x64xf32>
    %57 = tpu.matmul %56, %3, %cst_28 {dimension_numbers = #tpu.dot_dimension_numbers<[1], [0], [0], [1], [0, 0, 1, 1], [], []>} : vector<8x32xbf16>, vector<32x64xbf16>, vector<8x64xf32> -> vector<8x64xf32>
    %58 = vector.broadcast %9 : vector<1x64xf32> to vector<8x64xf32>
    %59 = arith.addf %57, %58 : vector<8x64xf32>
    %60 = vector.extract_strided_slice %59 {offsets = [0, 0], sizes = [8, 32], strides = [1, 1]} : vector<8x64xf32> to vector<8x32xf32>
    %61 = vector.extract_strided_slice %59 {offsets = [0, 32], sizes = [8, 32], strides = [1, 1]} : vector<8x64xf32> to vector<8x32xf32>
    %62 = arith.truncf %55 : vector<64x32xf32> to vector<64x32xbf16>
    %cst_29 = arith.constant dense<0.000000e+00> : vector<64x32xf32>
    %63 = tpu.matmul %62, %1, %cst_29 {dimension_numbers = #tpu.dot_dimension_numbers<[1], [0], [0], [1], [0, 0, 1, 1], [], []>} : vector<64x32xbf16>, vector<32x32xbf16>, vector<64x32xf32> -> vector<64x32xf32>
    %64 = vector.broadcast %7 : vector<1x32xf32> to vector<64x32xf32>
    %65 = arith.addf %63, %64 : vector<64x32xf32>
    %66 = vector.shape_cast %65 : vector<64x32xf32> to vector<8x8x32xf32>
    %67 = vector.shape_cast %60 : vector<8x32xf32> to vector<8x1x32xf32>
    %68 = vector.broadcast %67 : vector<8x1x32xf32> to vector<8x8x32xf32>
    %69 = arith.mulf %66, %68 : vector<8x8x32xf32>
    %cst_30 = arith.constant dense<0.000000e+00> : vector<8x8xf32>
    %70 = vector.multi_reduction <add>, %69, %cst_30 [2] : vector<8x8x32xf32> to vector<8x8xf32>
    %71 = vector.shape_cast %70 : vector<8x8xf32> to vector<8x8x1xf32>
    %cst_31 = arith.constant 0.176776692 : f32
    %72 = vector.broadcast %cst_31 : f32 to vector<8x8x1xf32>
    %73 = arith.mulf %71, %72 : vector<8x8x1xf32>
    %cst_32 = arith.constant dense<0xFF800000> : vector<8x1xf32>
    %74 = vector.multi_reduction <maximumf>, %73, %cst_32 [1] : vector<8x8x1xf32> to vector<8x1xf32>
    %75 = vector.shape_cast %74 : vector<8x1xf32> to vector<8x1x1xf32>
    %76 = vector.broadcast %75 : vector<8x1x1xf32> to vector<8x8x1xf32>
    %77 = arith.subf %73, %76 : vector<8x8x1xf32>
    %78 = math.exp %77 : vector<8x8x1xf32>
    %cst_33 = arith.constant dense<0.000000e+00> : vector<8x1xf32>
    %79 = vector.multi_reduction <add>, %78, %cst_33 [1] : vector<8x8x1xf32> to vector<8x1xf32>
    %80 = vector.shape_cast %79 : vector<8x1xf32> to vector<8x1x1xf32>
    %81 = tpu.reciprocal %80 {approx = true} : vector<8x1x1xf32> -> vector<8x1x1xf32>
    %82 = vector.broadcast %81 : vector<8x1x1xf32> to vector<8x8x1xf32>
    %83 = arith.mulf %78, %82 : vector<8x8x1xf32>
    %cst_34 = arith.constant 1.000000e+00 : f32
    %84 = vector.broadcast %cst_34 : f32 to vector<8x8x1xf32>
    %85 = arith.subf %84, %83 : vector<8x8x1xf32>
    %86 = vector.shape_cast %55 : vector<64x32xf32> to vector<8x8x32xf32>
    %87 = vector.broadcast %85 : vector<8x8x1xf32> to vector<8x8x32xf32>
    %88 = arith.mulf %87, %86 : vector<8x8x32xf32>
    %89 = vector.shape_cast %19 : vector<8x32xf32> to vector<8x1x32xf32>
    %90 = vector.broadcast %83 : vector<8x8x1xf32> to vector<8x8x32xf32>
    %91 = vector.broadcast %89 : vector<8x1x32xf32> to vector<8x8x32xf32>
    %92 = arith.mulf %90, %91 : vector<8x8x32xf32>
    %93 = arith.addf %88, %92 : vector<8x8x32xf32>
    %94 = vector.shape_cast %93 : vector<8x8x32xf32> to vector<64x32xf32>
    %95 = arith.truncf %94 : vector<64x32xf32> to vector<64x32xbf16>
    %cst_35 = arith.constant dense<0.000000e+00> : vector<64x32xf32>
    %96 = tpu.matmul %95, %2, %cst_35 {dimension_numbers = #tpu.dot_dimension_numbers<[1], [0], [0], [1], [0, 0, 1, 1], [], []>} : vector<64x32xbf16>, vector<32x32xbf16>, vector<64x32xf32> -> vector<64x32xf32>
    %97 = vector.broadcast %8 : vector<1x32xf32> to vector<64x32xf32>
    %98 = arith.addf %96, %97 : vector<64x32xf32>
    %99 = vector.shape_cast %98 : vector<64x32xf32> to vector<8x8x32xf32>
    %100 = vector.shape_cast %61 : vector<8x32xf32> to vector<8x1x32xf32>
    %101 = vector.broadcast %100 : vector<8x1x32xf32> to vector<8x8x32xf32>
    %102 = arith.mulf %99, %101 : vector<8x8x32xf32>
    %cst_36 = arith.constant dense<0.000000e+00> : vector<8x8xf32>
    %103 = vector.multi_reduction <add>, %102, %cst_36 [2] : vector<8x8x32xf32> to vector<8x8xf32>
    %104 = vector.shape_cast %103 : vector<8x8xf32> to vector<8x8x1xf32>
    %cst_37 = arith.constant 0.176776692 : f32
    %105 = vector.broadcast %cst_37 : f32 to vector<8x8x1xf32>
    %106 = arith.mulf %104, %105 : vector<8x8x1xf32>
    %cst_38 = arith.constant dense<0xFF800000> : vector<8x1xf32>
    %107 = vector.multi_reduction <maximumf>, %106, %cst_38 [1] : vector<8x8x1xf32> to vector<8x1xf32>
    %108 = vector.shape_cast %107 : vector<8x1xf32> to vector<8x1x1xf32>
    %109 = vector.broadcast %108 : vector<8x1x1xf32> to vector<8x8x1xf32>
    %110 = arith.subf %106, %109 : vector<8x8x1xf32>
    %111 = math.exp %110 : vector<8x8x1xf32>
    %cst_39 = arith.constant dense<0.000000e+00> : vector<8x1xf32>
    %112 = vector.multi_reduction <add>, %111, %cst_39 [1] : vector<8x8x1xf32> to vector<8x1xf32>
    %113 = vector.shape_cast %112 : vector<8x1xf32> to vector<8x1x1xf32>
    %114 = tpu.reciprocal %113 {approx = true} : vector<8x1x1xf32> -> vector<8x1x1xf32>
    %115 = vector.broadcast %114 : vector<8x1x1xf32> to vector<8x8x1xf32>
    %116 = arith.mulf %111, %115 : vector<8x8x1xf32>
    %117 = vector.broadcast %116 : vector<8x8x1xf32> to vector<8x8x32xf32>
    %118 = arith.mulf %117, %93 : vector<8x8x32xf32>
    %cst_40 = arith.constant dense<0.000000e+00> : vector<8x32xf32>
    %119 = vector.multi_reduction <add>, %118, %cst_40 [1] : vector<8x8x32xf32> to vector<8x32xf32>
    %c0_41 = arith.constant 0 : index
    %c0_42 = arith.constant 0 : index
    %120 = vector.load %arg9[%c0_41, %c0_42] : memref<64x64xf32, #tpu.memory_space<vmem>>, vector<64x32xf32>
    tpu.vector_store %arg9[%c0_41, %c0_42], %14 {strides = array<i32>} : memref<64x64xf32, #tpu.memory_space<vmem>>, vector<64x32xf32>,
    %c0_43 = arith.constant 0 : index
    %c32 = arith.constant 32 : index
    %121 = vector.load %arg9[%c0_43, %c32] : memref<64x64xf32, #tpu.memory_space<vmem>>, vector<64x32xf32>
    tpu.vector_store %arg9[%c0_43, %c32], %94 {strides = array<i32>} : memref<64x64xf32, #tpu.memory_space<vmem>>, vector<64x32xf32>,
    %c0_44 = arith.constant 0 : index
    %c0_45 = arith.constant 0 : index
    %122 = vector.load %arg9[%c0_44, %c0_45] : memref<64x64xf32, #tpu.memory_space<vmem>>, vector<64x64xf32>
    %123 = arith.truncf %122 : vector<64x64xf32> to vector<64x64xbf16>
    %cst_46 = arith.constant dense<0.000000e+00> : vector<64x32xf32>
    %124 = tpu.matmul %123, %4, %cst_46 {dimension_numbers = #tpu.dot_dimension_numbers<[1], [0], [0], [1], [0, 0, 1, 1], [], []>} : vector<64x64xbf16>, vector<64x32xbf16>, vector<64x32xf32> -> vector<64x32xf32>
    %125 = vector.broadcast %10 : vector<1x32xf32> to vector<64x32xf32>
    %126 = arith.addf %124, %125 : vector<64x32xf32>
    %127 = arith.negf %126 : vector<64x32xf32>
    %128 = math.exp %127 : vector<64x32xf32>
    %cst_47 = arith.constant 1.000000e+00 : f32
    %129 = vector.broadcast %cst_47 : f32 to vector<64x32xf32>
    %130 = arith.addf %129, %128 : vector<64x32xf32>
    %131 = arith.divf %129, %130 : vector<64x32xf32>
    %132 = arith.mulf %131, %14 : vector<64x32xf32>
    %cst_48 = arith.constant 1.000000e+00 : f32
    %133 = vector.broadcast %cst_48 : f32 to vector<64x32xf32>
    %134 = arith.subf %133, %131 : vector<64x32xf32>
    %135 = arith.mulf %134, %94 : vector<64x32xf32>
    %136 = arith.addf %132, %135 : vector<64x32xf32>
    %137 = vector.shape_cast %136 : vector<64x32xf32> to vector<8x8x32xf32>
    %c0_49 = arith.constant 0 : index
    %c0_50 = arith.constant 0 : index
    %c0_51 = arith.constant 0 : index
    %138 = vector.load %arg7[%c0_49, %c0_50, %c0_51] : memref<8x8x32xf32, #tpu.memory_space<vmem>>, vector<8x8x32xf32>
    tpu.vector_store %arg7[%c0_49, %c0_50, %c0_51], %137 {strides = array<i32>} : memref<8x8x32xf32, #tpu.memory_space<vmem>>, vector<8x8x32xf32>,
    %139 = vector.shape_cast %119 : vector<8x32xf32> to vector<8x1x32xf32>
    %c0_52 = arith.constant 0 : index
    %c0_53 = arith.constant 0 : index
    %c0_54 = arith.constant 0 : index
    %140 = vector.load %arg8[%c0_52, %c0_53, %c0_54] : memref<8x1x32xf32, #tpu.memory_space<vmem>>, vector<8x1x32xf32>
    tpu.vector_store %arg8[%c0_52, %c0_53, %c0_54], %139 {strides = array<i32>} : memref<8x1x32xf32, #tpu.memory_space<vmem>>, vector<8x1x32xf32>,
    return
  }
  func.func @transform_0(%arg0: i32) -> (i32, i32, i32) {
    %c0_i32 = arith.constant 0 : i32
    %c0_i32_0 = arith.constant 0 : i32
    %c0_i32_1 = arith.constant 0 : i32
    return %arg0, %c0_i32, %c0_i32_0 : i32, i32, i32
  }
  func.func @transform_1(%arg0: i32) -> (i32, i32, i32) {
    %c0_i32 = arith.constant 0 : i32
    %c0_i32_0 = arith.constant 0 : i32
    %c0_i32_1 = arith.constant 0 : i32
    return %arg0, %c0_i32, %c0_i32_0 : i32, i32, i32
  }
  func.func @transform_2(%arg0: i32) -> (i32, i32) {
    %c0_i32 = arith.constant 0 : i32
    %c0_i32_0 = arith.constant 0 : i32
    return %arg0, %c0_i32 : i32, i32
  }
  func.func @transform_3(%arg0: i32) -> (i32, i32) {
    %c0_i32 = arith.constant 0 : i32
    %c0_i32_0 = arith.constant 0 : i32
    %c0_i32_1 = arith.constant 0 : i32
    return %c0_i32, %c0_i32_0 : i32, i32
  }
  func.func @transform_4(%arg0: i32) -> (i32, i32) {
    %c0_i32 = arith.constant 0 : i32
    %c0_i32_0 = arith.constant 0 : i32
    %c0_i32_1 = arith.constant 0 : i32
    return %c0_i32, %c0_i32_0 : i32, i32
  }
  func.func @transform_5(%arg0: i32) -> (i32, i32) {
    %c0_i32 = arith.constant 0 : i32
    %c0_i32_0 = arith.constant 0 : i32
    %c0_i32_1 = arith.constant 0 : i32
    return %c0_i32, %c0_i32_0 : i32, i32
  }
  func.func @transform_6(%arg0: i32) -> (i32, i32, i32) {
    %c0_i32 = arith.constant 0 : i32
    %c0_i32_0 = arith.constant 0 : i32
    %c0_i32_1 = arith.constant 0 : i32
    return %arg0, %c0_i32, %c0_i32_0 : i32, i32, i32
  }
  func.func @transform_7(%arg0: i32) -> (i32, i32, i32) {
    %c0_i32 = arith.constant 0 : i32
    %c0_i32_0 = arith.constant 0 : i32
    %c0_i32_1 = arith.constant 0 : i32
    return %arg0, %c0_i32, %c0_i32_0 : i32, i32, i32
  }
}

</mosaic_0001>

<bundles_post_ra>
// kernel: tpu_custom_call.1
= control target key start
LH: loop header
LB: loop body
LE: loop exit
PB: predicated region body
PF: predicated region fallthrough
CT: control target
= control target key end

     0   :  { %13 = vsyncpa [#allocation4], 0  ;;  %s4269_s0 = inlined_call_operand.vmem [shape: bf16[2,64,128], index: 0, kind: input, shape index: {}]   ;;  %s4270_s1 = inlined_call_operand.hbm [shape: f32[16,8,32], index: 1, kind: input, shape index: {}]   ;;  %s4271_s2 = inlined_call_operand.vmem [shape: f32[16,1], index: 2, kind: input, shape index: {}]   ;;  %s4272_s3 = inlined_call_operand.hbm [shape: bf16[32,768], index: 3, kind: input, shape index: {}]   ;;  %s4273_s4 = inlined_call_operand.hbm [shape: f32[1,768], index: 4, kind: input, shape index: {}]   ;;  %s4274_s5 = inlined_call_operand.vmem [shape: bf16[64,32], index: 5, kind: input, shape index: {}]   ;;  %s4275_s6 = inlined_call_operand.hbm [shape: f32[16,8,32], index: 6, kind: output, shape index: {0}]   ;;  %s4276_s7 = inlined_call_operand.hbm [shape: f32[16,1,32], index: 7, kind: output, shape index: {1}]  }
   0x1   :  { %15 = vsyncpa [#allocation4 + $0x1], 0 }
   0x2   :  { %16 = vsyncpa [#allocation7], 0 }
   0x3   :  { %17 = vsyncpa [#allocation5], 0 }
   0x4   :  { %19 = vsyncpa [#allocation5 + $0x1], 0 }
   0x5   :  { %20 = vsyncpa [#allocation11], 0 }
   0x6   :  { %22 = vsyncpa [#allocation11 + $0x1], 0  ;;  %s3254_s24 = smov 0   ;;  %s3256_s25 = smov 0  }
   0x7   :  { %s3258_s26 = smov 0   ;;  %s3260_s27 = smov 0  }
   0x8 LB: > { %s3275_s28 = sadd.s32 4294967295, %s3192_s27   ;;  %s2534_s29 = sadd.s32 4294967294, %s3192_s27   ;;  %s3192_s27 = sphi %s3260_s27, %s4311_s27   ;;  %s3188_s26 = sphi %s3258_s26, %s4310_s26   ;;  %s3184_s25 = sphi %s3256_s25, %s4309_s25   ;;  %s3180_s24 = sphi %s3254_s24, %s4308_s24  }
   0x9   : > { %p74_p0 = scmp.ne.s32.totalorder %s3184_s25, %s3180_s24  ;;  %p4277_p1 = scmp.eq.s32.totalorder %s3275_s28, 0 }
   0xa   : > { %p193_p3 = scmp.eq.s32.totalorder %s2534_s29, 1  ;;  %p2535_p5 = scmp.ge.s32.totalorder %s3192_s27, 1 }
   0xb   : > { %p3284_p4 = por %p4277_p1, %p74_p0  ;;  %p226_p7 = scmp.lt.s32.totalorder %s3192_s27, 3 }
   0xc   : > { %p3289_p6 = por %p193_p3, %p74_p0  ;;  %s3194_s10 = smov [#allocation6]  }
   0xd   : > { %s4285_s30 = scalar_select %p3284_p4, 1, 0 }
   0xe   : > { %s4286_s8 = scalar_select %p3289_p6, 1, 0 }
   0xf   : > { %p3294_p8 = pnand %p2535_p5, %p226_p7  ;;  %s238_s11 = sshll.u32 %s3194_s10, 4  ;;  %s3298_s11 = int_to_ptr.vmem [resolvable:$true] %s238_s11 }
  0x10   : > { %s3195_s13 = smov [#allocation8]   ;;  %s3004_s17 = scalar_lea.hbm %s4272_s3, 1536 }
  0x11   : > { %p2762_p9 = pneg %p3294_p8  ;;  %s252_s14 = sshll.u32 %s3195_s13, 4  ;;  %s3309_s14 = int_to_ptr.vmem [resolvable:$true] %s252_s14 }
  0x12   : > { %p3005_p12 = scmp.ne.s32.totalorder %s4272_s3, %s3004_s17  ;;  %p3011_p5 = scmp.lt.u32.totalorder %s3004_s17, %s4272_s3 }
  0x13   : > { %p3305_p11 = pnand %p2762_p9, %p4277_p1 }
  0x15   : > { %p3006_p13 = pneg %p3305_p11 }
  0x17   : > { %p3007_p0 = pnand %p3006_p13, %p3005_p12 }
  0x19   : > { %p3008_p3 = pneg %p3007_p0 }
  0x1b   : > { %p3013_p7 = pnand %p3011_p5, %p3008_p3 }
  0x1d   : > { %3016 = shalt.err (!%p3013_p7)
}
  0x1e   : > { %s3017_s22 = scalar_lea.vmem %s3298_s11, 1536  ;;  %p3025_p2 = scmp.lt.s32.totalorder %s3298_s11, %s3298_s11 }
  0x1f   : > { %p3018_p9 = scmp.ne.s32.totalorder %s3298_s11, %s3017_s22  ;;  %p3026_p12 = scmp.lt.s32.totalorder %s3017_s22, %s3017_s22 }
  0x21   : > { %p3020_p10 = pnand %p3018_p9, %p3006_p13  ;;  %p3027_p0 = por %p3026_p12, %p3025_p2 }
  0x23   : > { %p3021_p1 = pneg %p3020_p10 }
  0x25   : > { %p3028_p6 = pnand %p3027_p0, %p3021_p1 }
  0x27   : > { %3031 = shalt.err (!%p3028_p6)
}
  0x28   : > { %s3196_s23 = smov 384   ;;  %s3197_s29 = smov 24  }
  0x29   : > { %2765 = dma.hbm_to_vmem [thread:$0]  (!%p3305_p11), %s4272_s3, 1536, %s3298_s11, [#allocation7], %s3196_s23, %s3196_s23, %s3197_s29  }
  0x2a   : > { %s3032_s17 = scalar_lea.hbm %s4273_s4, 96 }
  0x2b   : > { %p3033_p2 = scmp.ne.s32.totalorder %s4273_s4, %s3032_s17  ;;  %p3039_p10 = scmp.lt.u32.totalorder %s3032_s17, %s4273_s4 }
  0x2d   : > { %p3035_p1 = pnand %p3033_p2, %p3006_p13 }
  0x2f   : > { %p3036_p6 = pneg %p3035_p1 }
  0x31   : > { %p3041_p3 = pnand %p3039_p10, %p3036_p6 }
  0x33   : > { %3044 = shalt.err (!%p3041_p3)
}
  0x34   : > { %s3045_s11 = scalar_lea.vmem %s3309_s14, 96  ;;  %p3053_p12 = scmp.lt.s32.totalorder %s3309_s14, %s3309_s14 }
  0x35   : > { %p3046_p5 = scmp.ne.s32.totalorder %s3309_s14, %s3045_s11  ;;  %p3054_p0 = scmp.lt.s32.totalorder %s3045_s11, %s3045_s11 }
  0x37   : > { %p3048_p7 = pnand %p3046_p5, %p3006_p13  ;;  %p3055_p2 = por %p3054_p0, %p3053_p12 }
  0x39   : > { %p3049_p9 = pneg %p3048_p7 }
  0x3b   : > { %p3056_p1 = pnand %p3055_p2, %p3049_p9 }
  0x3d   : > { %3059 = shalt.err (!%p3056_p1)
}
  0x3e   : > { %2768 = dma.hbm_to_vmem [thread:$0]  (!%p3305_p11), %s4273_s4, 96, %s3309_s14, [#allocation7]  }
  0x3f   : > { %s3364_s29 = sadd.s32 1, %s3192_s27   ;;  %s61_s12 = sadd.s32 1, %s3188_s26 }
  0x40   : > { %s58_s10 = ssub.s32 %s3192_s27, %s3364_s29  ;;  %p68_p13 = scmp.ne.s32.totalorder %s3188_s26, %s3184_s25 }
  0x41   : > { %p59_p6 = scmp.eq.s32.totalorder %s58_s10, 0  ;;  %p69_p10 = scmp.eq.s32.totalorder %s3192_s27, 0 }
  0x42   : > { %p4289_p3 = scmp.eq.s32.totalorder %s3275_s28, 1  ;;  %p2782_p7 = scmp.lt.s32.totalorder %s3192_s27, 2 }
  0x43   : > { %s3380_s15 = scalar_select %p59_p6, %s3188_s26, %s61_s12  }
  0x44   : > { %p3374_p5 = por %p4289_p3, %p68_p13  ;;  %p70_p9 = por %p69_p10, %p68_p13 }
  0x45   : > { %s274_s16 = sand.u32 1, %s3188_s26   ;;  %s2619_s14 = sshll.u32 %s3192_s27, 10 }
  0x46   : > { %s4290_s13 = scalar_select %p3374_p5, 1, 0 }
  0x47   : > { %s2539_s17 = sshll.u32 %s274_s16, 6  ;;  %s3387_s20 = scalar_lea.hbm %s4270_s1, %s2619_s14 }
  0x48   : > { %s278_s21 = scalar_lea.vmem [#allocation3], %s2539_s17  ;;  %p3391_p11 = pnand %p2782_p7, %p70_p9 }
  0x49   : > { %s285_s11 = sshll.u32 %s278_s21, 4  ;;  %s3395_s23 = scalar_lea.sflag [#allocation4], %s274_s16  ;;  %s3389_s11 = int_to_ptr.vmem [resolvable:$true] %s285_s11 }
  0x4a   : > { %s3060_s12 = scalar_lea.hbm %s3387_s20, 1024  ;;  %p3062_p0 = pneg %p3391_p11 }
  0x4b   : > { %p3061_p12 = scmp.ne.s32.totalorder %s3387_s20, %s3060_s12  ;;  %s3065_s14 = scalar_lea.hbm %s4270_s1, 2048 }
  0x4c   : > { %p3066_p13 = scmp.lt.u32.totalorder %s3387_s20, %s4270_s1  ;;  %p3067_p6 = scmp.lt.u32.totalorder %s3065_s14, %s3060_s12 }
  0x4d   : > { %p3063_p2 = pnand %p3062_p0, %p3061_p12  ;;  %p3069_p3 = scmp.lt.u32.totalorder %s3060_s12, %s3387_s20 }
  0x4e   : > { %p3068_p10 = por %p3067_p6, %p3066_p13 }
  0x4f   : > { %p3064_p1 = pneg %p3063_p2 }
  0x50   : > { %p3070_p7 = por %p3069_p3, %p3068_p10 }
  0x52   : > { %p3071_p9 = pnand %p3070_p7, %p3064_p1 }
  0x54   : > { %3074 = shalt.err (!%p3071_p9)
}
  0x55   : > { %s3075_s16 = scalar_lea.vmem %s3389_s11, 1024  ;;  %s3198_s21 = smov [#allocation3]  }
  0x56   : > { %p3076_p12 = scmp.ne.s32.totalorder %s3389_s11, %s3075_s16  ;;  %s3080_s10 = sshll.u32 %s3198_s21, 4  ;;  %s3081_s10 = int_to_ptr.vmem [resolvable:$false] %s3080_s10 }
  0x57   : > { %s3082_s17 = scalar_lea.vmem %s3081_s10, 2048  ;;  %p3083_p4 = scmp.lt.s32.totalorder %s3389_s11, %s3081_s10 }
  0x58   : > { %p3078_p2 = pnand %p3076_p12, %p3062_p0  ;;  %p3084_p13 = scmp.lt.s32.totalorder %s3082_s17, %s3075_s16 }
  0x5a   : > { %p3079_p5 = pneg %p3078_p2  ;;  %p3085_p6 = por %p3084_p13, %p3083_p4 }
  0x5c   : > { %p3086_p10 = pnand %p3085_p6, %p3079_p5 }
  0x5e   : > { %3089 = shalt.err (!%p3086_p10)
}
  0x5f   : > { %s3199_s12 = smov 128   ;;  %s3200_s14 = smov 8  }
  0x60   : > { %2772 = dma.hbm_to_vmem [thread:$0]  (!%p3391_p11), %s3387_s20, 1024, %s3389_s11, %s3395_s23, %s3199_s12, %s3199_s12, %s3200_s14  }
  0x61   : > { %304 = sbr.rel (%p3294_p8) target bundleno = 2476 (0x9ac), region = 44 }
  0x68   : > { %s3426_s18 = sand.u32 1, %s3184_s25   ;;  %p4292_p4 = scmp.ne.s32.totalorder %s4285_s30, 0 }
  0x69   : > { %s2543_s19 = sshll.u32 %s3426_s18, 6  ;;  %s307_s16 = scalar_lea.sflag [#allocation4], %s3426_s18 }
  0x6a   : > { %s310_s21 = scalar_lea.vmem [#allocation3], %s2543_s19 }
  0x6b   : > { %3163 = dma.done.wait (%p4292_p4), %s307_s16, 1024  }
  0x6c   : > { %3165 = vsyncadd (%p4292_p4), %s307_s16, 4294966272  ;;  %p4293_p5 = scmp.eq.s32.totalorder %s3275_s28, 0 }
  0x6e   : > { %3167 = dma.done.wait (%p4293_p5), [#allocation7], 1632   ;;  %p4294_p8 = pmov %p4293_p5 }
  0x6f   : > { %v3201_v0 = vmov 0   ;;  %v2836_v1 = vld [vmem:[#allocation6 + $0x4] ss:$24 sps:$4 sm:$0xff]   ;;  %v2838_v2 = vld [vmem:[#allocation6] ss:$24 sps:$4 sm:$0xff]   ;;  %vm425_vm0 = vcmask 261120   ;;  %v515_v20 = vlaneseq }
  0x70   : > { %3169 = vsyncadd (%p4294_p8), [#allocation7], 4294965664  ;;  %606 = vmatprep.mubr.bf16.mxu0 %v3201_v0  ;;  %2835 = vset.pattern.permute.xlu0 %v3201_v0  ;;  %v2839_v3 = vld [vmem:[#allocation6 + $0x34] ss:$24 sps:$4 sm:$0xff]   ;;  %v2841_v4 = vld [vmem:[#allocation6 + $0x30] ss:$24 sps:$4 sm:$0xff]  }
  0x71   : > { %574 = vmatprep.subr.bf16.mxu0 %v2836_v1  ;;  %v3440_v5 = vld [vmem:[%s310_s21] sm:$0xff]  ;;  %v3442_v6 = vld [vmem:[%s310_s21 + $0x8] sm:$0xff]  ;;  %v3446_v7 = vld [vmem:[%s310_s21 + $0x10] sm:$0xff]  ;;  %p363_p11 = scmp.lt.s32.totalorder %s3275_s28, 1  ;;  %v3499_v21 = vshrl.u32 %v515_v20, 7  ;;  %s3202_s23 = smov 64  }
  0x72   : > { %575 = vmatpush1.bf16.msra.mxu0 %v2838_v2  ;;  %4295 = vst [vmem:[#allocation16_spill] sm:$0xff] %v3442_v6  ;;  %2029 = vst.msk [vmem:[#allocation2] sm:$0xff] %vm425_vm0, %v3440_v5  ;;  %v3448_v8 = vld [vmem:[%s310_s21 + $0x18] sm:$0xff]  ;;  %v510_v9 = vpack.c.bf16 %v3442_v6, %v3440_v5  ;;  %v3458_v10 = vld [vmem:[%s310_s21 + $0x20] sm:$0xff]  ;;  %s3203_s10 = smov 32   ;;  %vm3205_vm1 = vmmov 0  }
  0x73   : > { %576 = vmatprep.subr.bf16.mxu0 %v2839_v3  ;;  %2030 = vst.msk [vmem:[#allocation2 + $0x8] sm:$0xff] %vm425_vm0, %v3442_v6  ;;  %2031 = vst.msk [vmem:[#allocation2 + $0x10] sm:$0xff] %vm425_vm0, %v3446_v7  ;;  %v3460_v11 = vld [vmem:[%s310_s21 + $0x28] sm:$0xff]  ;;  %v3462_v12 = vld [vmem:[%s310_s21 + $0x30] sm:$0xff]  ;;  %v511_v16 = vpack.c.bf16 %v3448_v8, %v3446_v7  ;;  %s3490_s30 = scalar_select %p363_p11, %s3275_s28, 1  ;;  %v3502_v22 = vsub.s32 0, %v3499_v21 }
  0x74   : > { %2032 = vst.msk [vmem:[#allocation2 + $0x18] sm:$0xff] %vm425_vm0, %v3448_v8  ;;  %4296 = vst [vmem:[#allocation17_spill] sm:$0xff] %v3458_v10  ;;  %v3468_v13 = vld [vmem:[%s310_s21 + $0x38] sm:$0xff]  ;;  %2668 = vmatprep.mubr.msk.bf16.mxu1 %vm425_vm0, %v510_v9  ;;  %v2842_v14 = vld [vmem:[#allocation6 + $0x8] ss:$24 sps:$4 sm:$0xff]   ;;  %v512_v17 = vpack.c.bf16 %v3460_v11, %v3458_v10  ;;  %v521_v24 = vsub.s32 1, %v3499_v21 }
  0x75   : > { %4297 = vst [vmem:[#allocation18_spill] sm:$0xff] %v3460_v11  ;;  %4298 = vst [vmem:[#allocation19_spill] sm:$0xff] %v3462_v12  ;;  %v2843_v15 = vld [vmem:[#allocation6 + $0x38] ss:$24 sps:$4 sm:$0xff]   ;;  %2664 = vmatprep.subr.bf16.mxu1 %v2842_v14  ;;  %v513_v18 = vpack.c.bf16 %v3468_v13, %v3462_v12  ;;  %s2620_s9 = sshll.u32 %s3490_s30, 5  ;;  %v525_v28 = vsub.s32 2, %v3499_v21 }
  0x76   : > { %2033 = vst.msk [vmem:[#allocation2 + $0x20] sm:$0xff] %vm425_vm0, %v3458_v10  ;;  %2034 = vst.msk [vmem:[#allocation2 + $0x28] sm:$0xff] %vm425_vm0, %v3460_v11  ;;  %577 = vmatpush1.bf16.msra.mxu0 %v2841_v4  ;;  %2665 = vmatpush3.bf16.msra.mxu1 %v2842_v14  ;;  %s3496_s22 = scalar_lea.vmem %s4269_s0, %s2620_s9  ;;  %v404_v23 = vld [vmem:[#allocation8] sm:$0x7]  ;;  %s2550_s17 = sshll.u32 %s3490_s30, 3  ;;  %vm1109_vm2 = vcmask 1041409  }
  0x77   : > { %4299 = vst [vmem:[#allocation20_spill] sm:$0xff] %v3468_v13  ;;  %2035 = vst.msk [vmem:[#allocation2 + $0x30] sm:$0xff] %vm425_vm0, %v3462_v12  ;;  %2666 = vmatprep.subr.bf16.mxu1 %v2843_v15  ;;  %v2844_v19 = vld [vmem:[%s3496_s22] sm:$0xff]   ;;  %v3506_v25 = vrot.slane %v404_v23, %v3502_v22  ;;  %v3508_v27 = vrot.slane %v404_v23, %v521_v24  ;;  %v526_v36 = vrot.slane %v404_v23, %v525_v28  ;;  %s372_s16 = scalar_lea.vmem %s4271_s2, %s2550_s17  ;;  %vm1112_vm3 = vcmask 1042434   ;;  %s3207_s12 = smov 96  }
  0x78   : > { %2036 = vst.msk [vmem:[#allocation2 + $0x38] sm:$0xff] %vm425_vm0, %v3468_v13  ;;  %vm1115_vm4 = vcmask 1043459   ;;  %vm1118_vm5 = vcmask 1044484   ;;  %vm1121_vm6 = vcmask 1045509   ;;  %vm1124_vm7 = vcmask 1046534   ;;  %s4075_s14 = scalar_lea.vmem [#allocation9], %s2543_s19 }
  0x79   : > { %2557 = vmatmul.mubr.msk.bf16.vlgmr.msra.gmra.mrb[0].mxu0 %vm425_vm0, %v510_v9  ;;  %vm1127_vm8 = vcmask 1047559   ;;  %vm2069_vm9 = vcmask 523520   ;;  %vm2120_vm10 = vcmask 523264   ;;  %vm1972_vm11 = vcmask 785920   ;;  %s2621_s19 = sshll.u32 %s3275_s28, 10  ;;  %s2370_s9 = sshll.u32 %s4075_s14, 4  ;;  %s4179_s9 = int_to_ptr.vmem [resolvable:$true] %s2370_s9 }
  0x7a   : > { %616 = vmatprep.mubr.bf16.mxu0 %v3201_v0  ;;  %2667 = vmatpush3.bf16.msra.mxu1 %v2843_v15  ;;  %s4176_s30 = scalar_lea.hbm %s4275_s6, %s2621_s19  ;;  %s2352_s20 = scalar_lea.sflag [#allocation5], %s3426_s18 }
  0x7b   : > { %s3090_s11 = scalar_lea.vmem %s4179_s9, 1024  ;;  %p4305_p1 = scmp.ne.s32.totalorder %s4290_s13, 0 }
  0x7c   : > { %p3091_p0 = scmp.ne.s32.totalorder %s4179_s9, %s3090_s11 }
  0x7d   : > { %2669 = vmatmul.mubr.msk.bf16.vlgmr.msra.gmra.mrb[0].mxu1 %vm425_vm0, %v511_v16 }
  0x7e   : > { %2672 = vmatprep.mubr.msk.bf16.mxu1 %vm425_vm0, %v512_v17  ;;  %p3092_p3 = pnand %p3091_p0, %p4305_p1 }
  0x80   : > { %p3093_p7 = pneg %p3092_p3 }
  0x81   : > { %2558 = vmatmul.mubr.msk.bf16.gmra.mrb[4].mxu0 %vm425_vm0, %v511_v16 }
  0x82   : > { %626 = vmatprep.mubr.bf16.mxu0 %v3201_v0 }
  0x85   : > { %2673 = vmatmul.mubr.msk.bf16.gmra.mrb[4].mxu1 %vm425_vm0, %v513_v18 }
  0x89   : > { %2559 = vmatmul.mubr.msk.bf16.gmra.mrb[8].mxu0 %vm425_vm0, %v512_v17 }
  0x8a   : > { %636 = vmatprep.mubr.bf16.mxu0 %v3201_v0 }
  0x91   : > { %2560 = vmatmul.mubr.msk.bf16.gmra.mrb[12].mxu0 %vm425_vm0, %v513_v18 }
  0x92   : > { %2692 = vmatprep.mubr.bf16.mxu0 %v2844_v19 }
 0x14c   : > { %v608_v26 = vpop.f32.mrb[0].mxu0 }
 0x14d   : > { %v610_v29 = vpop.f32.mrb[1].mxu0  ;;  %v609_v31 = vadd.f32 %v608_v26, %v3506_v25 }
 0x14e   : > { %v612_v30 = vpop.f32.mrb[2].mxu0  ;;  %v611_v34 = vadd.f32 %v610_v29, %v3508_v27 }
 0x14f   : > { %v613_v32 = vadd.f32 %v612_v30, %v3506_v25  ;;  %v614_v33 = vpop.f32.mrb[3].mxu0 }
 0x150   : > { %v615_v35 = vadd.f32 %v614_v33, %v3508_v27  ;;  %v2670_v39 = vpop.f32.mrb[0].mxu1  ;;  %v2846_v33 = vld [vmem:[%s3496_s22 + $0x10] sm:$0xff]  }
 0x151   : > { %v712_v37 = vpack.c.bf16 %v613_v32, %v609_v31  ;;  %v3517_v41 = vadd.f32 %v2670_v39, %v526_v36  ;;  %v681_v42 = vpop.f32.mrb[1].mxu1 }
 0x152   : > { %v3515_v38 = vpack.c.bf16 %v615_v35, %v611_v34  ;;  %v3519_v44 = vadd.f32 %v681_v42, %v526_v36  ;;  %v2671_v45 = vpop.f32.mrb[2].mxu1  ;;  %v2565_v34 = vld [vmem:[#allocation8 + $0x3] ss:$0 sm:$0xff] }
 0x153   : > { %2676 = vmatprep.subr.bf16.mxu0 %v712_v37  ;;  %883 = vrot.lane.b32.xlu1 %v3517_v41, %s3202_s23  ;;  %v3523_v47 = vadd.f32 %v2671_v45, %v526_v36  ;;  %v684_v48 = vpop.f32.mrb[3].mxu1 }
 0x154   : > { %v618_v40 = vpop.f32.mrb[4].mxu0  ;;  %2677 = vmatpush3.bf16.msra.mxu0 %v712_v37  ;;  %879 = vrot.lane.b32.xlu0 %v3519_v44, %s3202_s23  ;;  %v3529_v52 = vadd.f32 %v684_v48, %v526_v36 }
 0x155   : > { %v620_v43 = vpop.f32.mrb[5].mxu0  ;;  %v619_v49 = vadd.f32 %v618_v40, %v3506_v25 }
 0x156   : > { %v622_v46 = vpop.f32.mrb[6].mxu0  ;;  %v621_v53 = vadd.f32 %v620_v43, %v3508_v27 }
 0x157   : > { %v623_v50 = vadd.f32 %v622_v46, %v3506_v25  ;;  %v624_v51 = vpop.f32.mrb[7].mxu0  ;;  %885 = vrot.lane.b32.xlu1 %v3523_v47, %s3202_s23 }
 0x158   : > { %v625_v54 = vadd.f32 %v624_v51, %v3508_v27  ;;  %881 = vrot.lane.b32.xlu0 %v3529_v52, %s3202_s23  ;;  %v2674_v57 = vpop.f32.mrb[4].mxu1 }
 0x159   : > { %v713_v55 = vpack.c.bf16 %v623_v50, %v619_v49  ;;  %v697_v59 = vpop.f32.mrb[5].mxu1  ;;  %v3541_v4 = vadd.f32 %v2674_v57, %v526_v36 }
 0x15a   : > { %v717_v56 = vpack.c.bf16 %v625_v54, %v621_v53  ;;  %v3537_v61 = vadd.f32 %v697_v59, %v526_v36  ;;  %v2675_v62 = vpop.f32.mrb[6].mxu1 }
 0x15b   : > { %2678 = vmatprep.subr.bf16.mxu0 %v713_v55  ;;  %v700_v0 = vpop.f32.mrb[7].mxu1  ;;  %v3549_v17 = vadd.f32 %v2675_v62, %v526_v36 }
 0x15c   : > { %v628_v58 = vpop.f32.mrb[8].mxu0  ;;  %2679 = vmatpush3.bf16.msra.mxu0 %v713_v55  ;;  %v3543_v9 = vadd.f32 %v700_v0, %v526_v36  ;;  %887 = vrot.lane.b32.xlu0 %v3537_v61, %s3202_s23 }
 0x15d   : > { %v630_v60 = vpop.f32.mrb[9].mxu0  ;;  %v629_v1 = vadd.f32 %v628_v58, %v3506_v25 }
 0x15e   : > { %v632_v63 = vpop.f32.mrb[10].mxu0  ;;  %v631_v14 = vadd.f32 %v630_v60, %v3508_v27  ;;  %889 = vrot.lane.b32.xlu1 %v3543_v9, %s3202_s23 }
 0x15f   : > { %v633_v2 = vadd.f32 %v632_v63, %v3506_v25  ;;  %v634_v3 = vpop.f32.mrb[11].mxu0 }
 0x160   : > { %v635_v15 = vadd.f32 %v634_v3, %v3508_v27  ;;  %891 = vrot.lane.b32.xlu0 %v3541_v4, %s3202_s23 }
 0x161   : > { %v714_v16 = vpack.c.bf16 %v633_v2, %v629_v1 }
 0x162   : > { %v718_v18 = vpack.c.bf16 %v635_v15, %v631_v14  ;;  %893 = vrot.lane.b32.xlu1 %v3549_v17, %s3202_s23 }
 0x163   : > { %2680 = vmatprep.subr.bf16.mxu0 %v714_v16 }
 0x164   : > { %v638_v19 = vpop.f32.mrb[12].mxu0  ;;  %2681 = vmatpush3.bf16.msra.mxu0 %v714_v16 }
 0x165   : > { %v640_v20 = vpop.f32.mrb[13].mxu0  ;;  %v639_v24 = vadd.f32 %v638_v19, %v3506_v25 }
 0x166   : > { %v642_v23 = vpop.f32.mrb[14].mxu0  ;;  %v641_v29 = vadd.f32 %v640_v20, %v3508_v27 }
 0x167   : > { %v643_v26 = vadd.f32 %v642_v23, %v3506_v25  ;;  %v644_v28 = vpop.f32.mrb[15].mxu0  ;;  %v2845_v25 = vld [vmem:[%s3496_s22 + $0x8] sm:$0xff]  }
 0x168   : > { %v645_v30 = vadd.f32 %v644_v28, %v3508_v27  ;;  %v2847_v27 = vld [vmem:[%s3496_s22 + $0x18] sm:$0xff]   ;;  %s3208_s22 = smov [#allocation9]  }
 0x169   : > { %v715_v31 = vpack.c.bf16 %v643_v26, %v639_v24 }
 0x16a   : > { %v719_v32 = vpack.c.bf16 %v645_v30, %v641_v29 }
 0x16b   : > { %2682 = vmatprep.subr.bf16.mxu0 %v715_v31 }
 0x16c   : > { %2683 = vmatpush3.bf16.msra.mxu0 %v715_v31 }
 0x16d   : > { %2684 = vmatprep.subr.bf16.mxu0 %v3515_v38 }
 0x170   : > { %2685 = vmatpush3.bf16.msra.mxu0 %v3515_v38 }
 0x171   : > { %2686 = vmatprep.subr.bf16.mxu0 %v717_v56 }
 0x174   : > { %2687 = vmatpush3.bf16.msra.mxu0 %v717_v56 }
 0x175   : > { %2688 = vmatprep.subr.bf16.mxu0 %v718_v18 }
 0x178   : > { %2689 = vmatpush3.bf16.msra.mxu0 %v718_v18 }
 0x179   : > { %2690 = vmatprep.subr.bf16.mxu0 %v719_v32 }
 0x17c   : > { %2691 = vmatpush3.bf16.msra.mxu0 %v719_v32 }
 0x17f   : > { %2693 = vmatmul.mubr.bf16.vlgmr.msra.gmra.mrb[16].mxu0 %v2845_v25 }
 0x180   : > { %2696 = vmatprep.mubr.bf16.mxu0 %v2846_v33 }
 0x187   : > { %2697 = vmatmul.mubr.bf16.gmra.mrb[20].mxu0 %v2847_v27 }
 0x1c5   : > { %v884_v29 = vpop.permute.xlu1 %883 }
 0x252   : > { %v2694_v35 = vpop.f32.mrb[16].mxu0 }
 0x253   : > { %v3566_v36 = vadd.f32 %v2694_v35, %v2565_v34  ;;  %v784_v37 = vpop.f32.mrb[17].mxu0 }
 0x254   : > { %v3568_v39 = vadd.f32 %v2565_v34, %v784_v37  ;;  %v2695_v38 = vpop.f32.mrb[18].mxu0  ;;  %v886_v37 = vpop.permute.xlu1 %885 }
 0x255   : > { %v817_v40 = vadd.f32 %v3566_v36, %v3517_v41  ;;  %v3572_v42 = vadd.f32 %v2695_v38, %v2565_v34  ;;  %v787_v43 = vpop.f32.mrb[19].mxu0 }
 0x256   : > { %v815_v45 = vadd.f32 %v3568_v39, %v3519_v44  ;;  %v3576_v46 = vadd.f32 %v2565_v34, %v787_v43 }
 0x257   : > { %v2572_v48 = vmul.f32 -1.442695, %v817_v40  ;;  %v818_v49 = vadd.f32 %v3572_v42, %v3523_v47 }
 0x258   : > { %v2570_v50 = vmul.f32 -1.442695, %v815_v45  ;;  %v816_v51 = vadd.f32 %v3576_v46, %v3529_v52 }
 0x259   : > { %2858 = vpow2.f32 %v2572_v48  ;;  %v2573_v53 = vmul.f32 -1.442695, %v818_v49  ;;  %v890_v48 = vpop.permute.xlu1 %889 }
 0x25a   : > { %2860 = vpow2.f32 %v2570_v50  ;;  %v2571_v41 = vmul.f32 -1.442695, %v816_v51  ;;  %v2698_v54 = vpop.f32.mrb[20].mxu0 }
 0x25b   : > { %2862 = vpow2.f32 %v2573_v53  ;;  %v3582_v55 = vadd.f32 %v2698_v54, %v2565_v34  ;;  %v800_v56 = vpop.f32.mrb[21].mxu0 }
 0x25c   : > { %2864 = vpow2.f32 %v2571_v41  ;;  %v3584_v44 = vadd.f32 %v2565_v34, %v800_v56  ;;  %v2699_v57 = vpop.f32.mrb[22].mxu0 }
 0x25d   : > { %v821_v47 = vadd.f32 %v3582_v55, %v3541_v4  ;;  %v3588_v58 = vadd.f32 %v2699_v57, %v2565_v34  ;;  %v803_v59 = vpop.f32.mrb[23].mxu0 }
 0x25e   : > { %v819_v52 = vadd.f32 %v3584_v44, %v3537_v61  ;;  %v3592_v60 = vadd.f32 %v2565_v34, %v803_v59 }
 0x25f   : > { %v2576_v62 = vmul.f32 -1.442695, %v821_v47  ;;  %v822_v63 = vadd.f32 %v3588_v58, %v3549_v17  ;;  %v894_v47 = vpop.permute.xlu1 %893 }
 0x260   : > { %v2574_v0 = vmul.f32 -1.442695, %v819_v52  ;;  %v820_v1 = vadd.f32 %v3592_v60, %v3543_v9  ;;  %v880_v9 = vpop.permute.xlu0 %879 }
 0x261   : > { %2866 = vpow2.f32 %v2576_v62  ;;  %v2577_v2 = vmul.f32 -1.442695, %v822_v63 }
 0x262   : > { %2868 = vpow2.f32 %v2574_v0  ;;  %v2575_v3 = vmul.f32 -1.442695, %v820_v1 }
 0x263   : > { %v2859_v4 = vpop.eup %2858  ;;  %2870 = vpow2.f32 %v2577_v2 }
 0x264   : > { %v2861_v14 = vpop.eup %2860  ;;  %v849_v15 = vadd.f32 1.0, %v2859_v4  ;;  %2872 = vpow2.f32 %v2575_v3  ;;  %v882_v33 = vpop.permute.xlu0 %881 }
 0x265   : > { %v2863_v61 = vpop.eup %2862  ;;  %v847_v16 = vadd.f32 1.0, %v2861_v14 }
 0x266   : > { %v2865_v18 = vpop.eup %2864  ;;  %v850_v19 = vadd.f32 1.0, %v2863_v61 }
 0x267   : > { %2874 = vrcp.f32 %v847_v16  ;;  %v848_v20 = vadd.f32 1.0, %v2865_v18 }
 0x268   : > { %2876 = vrcp.f32 %v849_v15  ;;  %v888_v43 = vpop.permute.xlu0 %887 }
 0x269   : > { %2878 = vrcp.f32 %v848_v20 }
 0x26a   : > { %2880 = vrcp.f32 %v850_v19 }
 0x26b   : > { %v2867_v17 = vpop.eup %2866 }
 0x26c   : > { %v2869_v23 = vpop.eup %2868  ;;  %v853_v24 = vadd.f32 1.0, %v2867_v17  ;;  %v892_v54 = vpop.permute.xlu0 %891 }
 0x26d   : > { %v2871_v26 = vpop.eup %2870  ;;  %v851_v28 = vadd.f32 1.0, %v2869_v23 }
 0x26e   : > { %v2873_v30 = vpop.eup %2872  ;;  %v854_v31 = vadd.f32 1.0, %v2871_v26 }
 0x26f   : > { %2882 = vrcp.f32 %v851_v28  ;;  %v852_v32 = vadd.f32 1.0, %v2873_v30 }
 0x270   : > { %2884 = vrcp.f32 %v853_v24 }
 0x271   : > { %v3598_v25 = vpop.eup %2874  ;;  %2886 = vrcp.f32 %v852_v32 }
 0x272   : > { %v3600_v27 = vpop.eup %2876  ;;  %v903_v34 = vmul.f32 %v3598_v25, %v880_v9  ;;  %2888 = vrcp.f32 %v854_v31 }
 0x273   : > { %v3603_v35 = vpop.eup %2878  ;;  %v905_v45 = vmul.f32 %v3600_v27, %v884_v29 }
 0x274   : > { %v904_v38 = vmul.f32 %v3603_v35, %v882_v33  ;;  %919 = vrot.lane.b32.xlu0 %v903_v34, %s3202_s23  ;;  %v3607_v40 = vpop.eup %2880 }
 0x275   : > { %v906_v49 = vmul.f32 %v3607_v40, %v886_v37 }
 0x276   : > { %921 = vrot.lane.b32.xlu1 %v904_v38, %s3202_s23 }
 0x278   : > { %923 = vrot.lane.b32.xlu0 %v905_v45, %s3202_s23 }
 0x279   : > { %v3613_v50 = vpop.eup %2882 }
 0x27a   : > { %v3615_v51 = vpop.eup %2884  ;;  %v907_v53 = vmul.f32 %v3613_v50, %v888_v43  ;;  %925 = vrot.lane.b32.xlu1 %v906_v49, %s3202_s23 }
 0x27b   : > { %v3619_v41 = vpop.eup %2886  ;;  %v909_v59 = vmul.f32 %v3615_v51, %v892_v54 }
 0x27c   : > { %v908_v56 = vmul.f32 %v3619_v41, %v890_v48  ;;  %927 = vrot.lane.b32.xlu0 %v907_v53, %s3202_s23  ;;  %v3623_v57 = vpop.eup %2888 }
 0x27d   : > { %v910_v52 = vmul.f32 %v3623_v57, %v894_v47 }
 0x27e   : > { %929 = vrot.lane.b32.xlu1 %v908_v56, %s3202_s23 }
 0x280   : > { %931 = vrot.lane.b32.xlu0 %v909_v59, %s3202_s23  ;;  %v424_v59 = vld [vmem:[%s372_s16] sm:$0xff] }
 0x282   : > { %933 = vrot.lane.b32.xlu1 %v910_v52, %s3202_s23 }
 0x2e6   : > { %v920_v62 = vpop.permute.xlu0 %919 }
 0x2e7   : > { %v943_v63 = vadd.f32 %v920_v62, %v3568_v39 }
 0x2e8   : > { %v922_v0 = vpop.permute.xlu1 %921 }
 0x2e9   : > { %2890 = vtanh.f32 %v943_v63  ;;  %v944_v1 = vadd.f32 %v922_v0, %v3576_v46 }
 0x2ea   : > { %v924_v2 = vpop.permute.xlu0 %923 }
 0x2eb   : > { %2892 = vtanh.f32 %v944_v1  ;;  %v945_v3 = vadd.f32 %v924_v2, %v3566_v36 }
 0x2ec   : > { %v926_v4 = vpop.permute.xlu1 %925 }
 0x2ed   : > { %2894 = vtanh.f32 %v945_v3  ;;  %v946_v14 = vadd.f32 %v926_v4, %v3572_v42 }
 0x2ee   : > { %v928_v15 = vpop.permute.xlu0 %927 }
 0x2ef   : > { %2896 = vtanh.f32 %v946_v14  ;;  %v947_v61 = vadd.f32 %v928_v15, %v3584_v44  ;;  %v3204_v15 = vmov 0.0  }
 0x2f0   : > { %v930_v16 = vpop.permute.xlu1 %929  ;;  %2700 = vmatprep.subr.bf16.mxu1 %v3204_v15  ;;  %2704 = vmatprep.mubr.msk.bf16.mxu1 %vm3205_vm1, %v3204_v15 }
 0x2f1   : > { %2898 = vtanh.f32 %v947_v61  ;;  %v948_v39 = vadd.f32 %v930_v16, %v3592_v60 }
 0x2f2   : > { %v932_v18 = vpop.permute.xlu0 %931 }
 0x2f3   : > { %v3636_v19 = vpop.eup %2890  ;;  %2900 = vtanh.f32 %v948_v39  ;;  %v949_v46 = vadd.f32 %v932_v18, %v3582_v55  ;;  %v426_v18 = vsel %vm425_vm0, %v3440_v5, 0.0 }
 0x2f4   : > { %v934_v20 = vpop.permute.xlu1 %933  ;;  %967 = vrot.lane.b32.xlu0 %v3636_v19, %s3202_s23 }
 0x2f5   : > { %v3641_v36 = vpop.eup %2892  ;;  %2902 = vtanh.f32 %v949_v46  ;;  %v950_v42 = vadd.f32 %v934_v20, %v3588_v58  ;;  %v433_v46 = vsel %vm425_vm0, %v3442_v6, 0.0 }
 0x2f6   : > { %969 = vrot.lane.b32.xlu1 %v3641_v36, %s3202_s23 }
 0x2f7   : > { %v3646_v44 = vpop.eup %2894  ;;  %2904 = vtanh.f32 %v950_v42  ;;  %v440_v42 = vsel %vm425_vm0, %v3446_v7, 0.0 }
 0x2f8   : > { %971 = vrot.lane.b32.xlu0 %v3646_v44, %s3202_s23  ;;  %2906 = vrcp.f32 %v424_v59 }
 0x2f9   : > { %v3650_v60 = vpop.eup %2896 }
 0x2fa   : > { %973 = vrot.lane.b32.xlu1 %v3650_v60, %s3202_s23 }
 0x2fb   : > { %v3654_v55 = vpop.eup %2898 }
 0x2fc   : > { %975 = vrot.lane.b32.xlu0 %v3654_v55, %s3202_s23 }
 0x2fd   : > { %v3658_v58 = vpop.eup %2900 }
 0x2fe   : > { %977 = vrot.lane.b32.xlu1 %v3658_v58, %s3202_s23 }
 0x2ff   : > { %v3662_v17 = vpop.eup %2902 }
 0x300   : > { %979 = vrot.lane.b32.xlu0 %v3662_v17, %s3202_s23 }
 0x301   : > { %v3666_v9 = vpop.eup %2904 }
 0x302   : > { %981 = vrot.lane.b32.xlu1 %v3666_v9, %s3202_s23  ;;  %v2907_v14 = vpop.eup %2906 }
 0x366   : > { %v968_v23 = vpop.permute.xlu0 %967 }
 0x367   : > { %v991_v24 = vsub.f32 %v3440_v5, %v968_v23  ;;  %v447_v23 = vsel %vm425_vm0, %v3448_v8, 0.0 }
 0x368   : > { %v970_v26 = vpop.permute.xlu1 %969 }
 0x369   : > { %v992_v28 = vsub.f32 %v3442_v6, %v970_v26  ;;  %1007 = vrot.lane.b32.xlu0 %v991_v24, %s3203_s10  ;;  %v461_v24 = vsel %vm425_vm0, %v3460_v11, 0.0  ;;  %v468_v26 = vsel %vm425_vm0, %v3462_v12, 0.0 }
 0x36a   : > { %v972_v29 = vpop.permute.xlu0 %971 }
 0x36b   : > { %v993_v30 = vsub.f32 %v3446_v7, %v972_v29  ;;  %1009 = vrot.lane.b32.xlu1 %v992_v28, %s3203_s10  ;;  %v475_v28 = vsel %vm425_vm0, %v3468_v13, 0.0 }
 0x36c   : > { %v974_v31 = vpop.permute.xlu1 %973 }
 0x36d   : > { %v994_v32 = vsub.f32 %v3448_v8, %v974_v31  ;;  %1011 = vrot.lane.b32.xlu0 %v993_v30, %s3203_s10  ;;  %v427_v30 = vrot.slane %v426_v18, 4 }
 0x36e   : > { %v976_v33 = vpop.permute.xlu0 %975 }
 0x36f   : > { %v995_v34 = vsub.f32 %v3458_v10, %v976_v33  ;;  %1013 = vrot.lane.b32.xlu1 %v994_v32, %s3203_s10  ;;  %v434_v33 = vrot.slane %v433_v46, 4 }
 0x370   : > { %v978_v37 = vpop.permute.xlu1 %977 }
 0x371   : > { %v996_v38 = vsub.f32 %v3460_v11, %v978_v37  ;;  %1015 = vrot.lane.b32.xlu0 %v995_v34, %s3203_s10  ;;  %v441_v34 = vrot.slane %v440_v42, 4  ;;  %v448_v37 = vrot.slane %v447_v23, 4 }
 0x372   : > { %v980_v43 = vpop.permute.xlu0 %979 }
 0x373   : > { %v997_v45 = vsub.f32 %v3462_v12, %v980_v43  ;;  %1017 = vrot.lane.b32.xlu1 %v996_v38, %s3203_s10  ;;  %v442_v59 = vadd.f32 %v441_v34, %v440_v42 }
 0x374   : > { %v982_v48 = vpop.permute.xlu1 %981 }
 0x375   : > { %v998_v49 = vsub.f32 %v3468_v13, %v982_v48  ;;  %1019 = vrot.lane.b32.xlu0 %v997_v45, %s3203_s10  ;;  %v462_v45 = vrot.slane %v461_v24, 4  ;;  %v469_v48 = vrot.slane %v468_v26, 4 }
 0x377   : > { %1021 = vrot.lane.b32.xlu1 %v998_v49, %s3203_s10  ;;  %v476_v49 = vrot.slane %v475_v28, 4 }
 0x3db   : > { %v1008_v53 = vpop.permute.xlu0 %1007 }
 0x3dc   : > { %v1031_v54 = vmul.f32 %v3598_v25, %v1008_v53 }
 0x3dd   : > { %v1010_v56 = vpop.permute.xlu1 %1009 }
 0x3de   : > { %v1032_v47 = vmul.f32 %v3603_v35, %v1010_v56  ;;  %1047 = vrot.lane.b32.xlu0 %v1031_v54, %s3203_s10  ;;  %v428_v56 = vadd.f32 %v427_v30, %v426_v18 }
 0x3df   : > { %v1012_v52 = vpop.permute.xlu0 %1011 }
 0x3e0   : > { %v1033_v62 = vmul.f32 %v3600_v27, %v1012_v52  ;;  %1049 = vrot.lane.b32.xlu1 %v1032_v47, %s3203_s10  ;;  %v435_v47 = vadd.f32 %v434_v33, %v433_v46  ;;  %v449_v52 = vadd.f32 %v448_v37, %v447_v23 }
 0x3e1   : > { %v1014_v63 = vpop.permute.xlu1 %1013 }
 0x3e2   : > { %v1034_v0 = vmul.f32 %v3607_v40, %v1014_v63  ;;  %1051 = vrot.lane.b32.xlu0 %v1033_v62, %s3203_s10 }
 0x3e3   : > { %v1016_v1 = vpop.permute.xlu0 %1015 }
 0x3e4   : > { %v1035_v25 = vmul.f32 %v3613_v50, %v1016_v1  ;;  %1053 = vrot.lane.b32.xlu1 %v1034_v0, %s3203_s10  ;;  %v2848_v50 = vld [vmem:[#allocation6 + $0x14] ss:$24 sps:$4 sm:$0xff]   ;;  %v463_v0 = vadd.f32 %v462_v45, %v461_v24  ;;  %v470_v1 = vadd.f32 %v469_v48, %v468_v26 }
 0x3e5   : > { %v1018_v35 = vpop.permute.xlu1 %1017  ;;  %2701 = vmatpush3.bf16.msra.mxu1 %v2848_v50  ;;  %v3758_v50 = vld [vmem:[#allocation8 + $0x4] ss:$0 sm:$0xff] }
 0x3e6   : > { %v1036_v2 = vmul.f32 %v3619_v41, %v1018_v35  ;;  %1055 = vrot.lane.b32.xlu0 %v1035_v25, %s3203_s10  ;;  %v2849_v41 = vld [vmem:[#allocation6 + $0x44] ss:$24 sps:$4 sm:$0xff]   ;;  %2702 = vmatprep.subr.bf16.mxu1 %v3204_v15  ;;  %v477_v25 = vadd.f32 %v476_v49, %v475_v28  ;;  %v464_v15 = vrot.slane %v463_v0, 2 }
 0x3e7   : > { %v1020_v3 = vpop.permute.xlu0 %1019 }
 0x3e8   : > { %v1037_v27 = vmul.f32 %v3615_v51, %v1020_v3  ;;  %1057 = vrot.lane.b32.xlu1 %v1036_v2, %s3203_s10  ;;  %v3706_v51 = vld [vmem:[#allocation6 + $0xc] ss:$24 sps:$4 sm:$0xff]   ;;  %v429_v3 = vrot.slane %v428_v56, 2  ;;  %v465_v42 = vadd.f32 %v464_v15, %v463_v0 }
 0x3e9   : > { %v1022_v4 = vpop.permute.xlu1 %1021  ;;  %2703 = vmatpush3.bf16.msra.mxu1 %v2849_v41  ;;  %v471_v41 = vrot.slane %v470_v1, 2 }
 0x3ea   : > { %v1038_v40 = vmul.f32 %v3623_v57, %v1022_v4  ;;  %1059 = vrot.lane.b32.xlu0 %v1037_v27, %s3203_s10  ;;  %2708 = vmatprep.subr.bf16.mxu1 %v3706_v51  ;;  %v436_v27 = vrot.slane %v435_v47, 2  ;;  %v443_v4 = vrot.slane %v442_v59, 2  ;;  %v430_v18 = vadd.f32 %v429_v3, %v428_v56 }
 0x3eb   : > { %v472_v23 = vadd.f32 %v471_v41, %v470_v1  ;;  %v466_v30 = vrot.slane %v465_v42, 1 }
 0x3ec   : > { %1061 = vrot.lane.b32.xlu1 %v1038_v40, %s3203_s10  ;;  %v450_v40 = vrot.slane %v449_v52, 2  ;;  %s3094_s10 = sshll.u32 %s3208_s22, 4  ;;  %s3095_s10 = int_to_ptr.vmem [resolvable:$false] %s3094_s10 }
 0x3ed   : > { %v473_v33 = vrot.slane %v472_v23, 1  ;;  %v467_v49 = vadd.f32 %v466_v30, %v465_v42  ;;  %s3096_s17 = scalar_lea.vmem %s3095_s10, 2048  ;;  %p3097_p9 = scmp.lt.s32.totalorder %s4179_s9, %s3095_s10 }
 0x3ee   : > { %485 = vperm.xlu0 %2835, %v2907_v14   ;;  %v451_v46 = vadd.f32 %v450_v40, %v449_v52  ;;  %p3098_p12 = scmp.lt.s32.totalorder %s3096_s17, %s3090_s11 }
 0x3f0   : > { %v452_v28 = vrot.slane %v451_v46, 1  ;;  %p3099_p2 = por %p3098_p12, %p3097_p9 }
 0x3f2   : > { %v453_v45 = vadd.f32 %v452_v28, %v451_v46  ;;  %p3100_p13 = pnand %p3099_p2, %p3093_p7 }
 0x450   : > { %v1048_v57 = vpop.permute.xlu0 %1047 }
 0x451   : > { %v3710_v16 = vadd.f32 %v3636_v19, %v1048_v57  ;;  %v454_v19 = vsel %vm425_vm0, %v3458_v10, 0.0  ;;  %v478_v57 = vrot.slane %v477_v25, 2 }
 0x452   : > { %v1050_v61 = vpop.permute.xlu1 %1049  ;;  %v455_v38 = vrot.slane %v454_v19, 4 }
 0x453   : > { %v3713_v39 = vadd.f32 %v3641_v36, %v1050_v61 }
 0x454   : > { %v1052_v20 = vpop.permute.xlu0 %1051  ;;  %v456_v62 = vadd.f32 %v455_v38, %v454_v19  ;;  %v479_v19 = vadd.f32 %v478_v57, %v477_v25 }
 0x455   : > { %v1188_v36 = vpack.c.bf16 %v3713_v39, %v3710_v16  ;;  %v3734_v31 = vadd.f32 %v3646_v44, %v1052_v20 }
 0x456   : > { %v1054_v29 = vpop.permute.xlu1 %1053  ;;  %v457_v14 = vrot.slane %v456_v62, 2  ;;  %v480_v34 = vrot.slane %v479_v19, 1 }
 0x457   : > { %v3737_v32 = vadd.f32 %v3650_v60, %v1054_v29  ;;  %1197 = vrot.lane.b32.xlu1 %v1188_v36, %s3202_s23  ;;  %v431_v36 = vrot.slane %v430_v18, 1 }
 0x458   : > { %v1056_v43 = vpop.permute.xlu0 %1055  ;;  %v458_v20 = vadd.f32 %v457_v14, %v456_v62 }
 0x459   : > { %v1189_v53 = vpack.c.bf16 %v3737_v32, %v3734_v31  ;;  %v3743_v44 = vadd.f32 %v3654_v55, %v1056_v43  ;;  %v432_v37 = vadd.f32 %v431_v36, %v430_v18 }
 0x45a   : > { %v1058_v54 = vpop.permute.xlu1 %1057  ;;  %v459_v29 = vrot.slane %v458_v20, 1 }
 0x45b   : > { %v3746_v60 = vadd.f32 %v3658_v58, %v1058_v54  ;;  %1199 = vrot.lane.b32.xlu1 %v1189_v53, %s3202_s23  ;;  %v474_v53 = vadd.f32 %v473_v33, %v472_v23  ;;  %v481_v54 = vadd.f32 %v480_v34, %v479_v19 }
 0x45c   : > { %v1060_v63 = vpop.permute.xlu0 %1059  ;;  %v460_v48 = vadd.f32 %v459_v29, %v458_v20 }
 0x45d   : > { %v1190_v35 = vpack.c.bf16 %v3746_v60, %v3743_v44  ;;  %v3752_v55 = vadd.f32 %v3662_v17, %v1060_v63  ;;  %v437_v17 = vadd.f32 %v436_v27, %v435_v47 }
 0x45e   : > { %v1062_v2 = vpop.permute.xlu1 %1061 }
 0x45f   : > { %v3755_v58 = vadd.f32 %v3666_v9, %v1062_v2  ;;  %1201 = vrot.lane.b32.xlu0 %v1190_v35, %s3202_s23  ;;  %v444_v9 = vadd.f32 %v443_v4, %v442_v59  ;;  %v438_v24 = vrot.slane %v437_v17, 1 }
 0x461   : > { %v1191_v61 = vpack.c.bf16 %v3755_v58, %v3752_v55  ;;  %v445_v26 = vrot.slane %v444_v9, 1  ;;  %v439_v38 = vadd.f32 %v438_v24, %v437_v17 }
 0x463   : > { %1203 = vrot.lane.b32.xlu1 %v1191_v61, %s3202_s23  ;;  %1142 = vrot.lane.b32.xlu0 %v3758_v50, %s3202_s23  ;;  %v446_v43 = vadd.f32 %v445_v26, %v444_v9 }
 0x46d   : > { %v486_v56 = vpop.permute.xlu0 %485 }
 0x46e   : > { %v487_v47 = vrot.slane %v486_v56, 1  ;;  %v488_v59 = vrot.slane %v486_v56, 2  ;;  %v489_v52 = vrot.slane %v486_v56, 3  ;;  %v490_v62 = vrot.slane %v486_v56, 4 }
 0x46f   : > { %v491_v63 = vrot.slane %v486_v56, 5  ;;  %v492_v0 = vrot.slane %v486_v56, 6  ;;  %v493_v1 = vrot.slane %v486_v56, 7  ;;  %v3765_v25 = vmul.f32 %v486_v56, %v432_v37 }
 0x470   : > { %v3767_v35 = vmul.f32 %v487_v47, %v439_v38  ;;  %v3769_v2 = vmul.f32 %v488_v59, %v446_v43  ;;  %v3771_v3 = vmul.f32 %v489_v52, %v453_v45  ;;  %v3773_v27 = vmul.f32 %v490_v62, %v460_v48  ;;  %v2851_v52 = vld [vmem:[#allocation6 + $0x3c] ss:$24 sps:$4 sm:$0xff]  }
 0x471   : > { %v3775_v4 = vmul.f32 %v491_v63, %v467_v49  ;;  %v3777_v40 = vmul.f32 %v492_v0, %v474_v53  ;;  %v3779_v14 = vmul.f32 %v493_v1, %v481_v54  ;;  %v1079_v15 = vpack.c.bf16 %v3765_v25, %v3765_v25 }
 0x472   : > { %v1080_v41 = vpack.c.bf16 %v3767_v35, %v3767_v35  ;;  %v1081_v57 = vpack.c.bf16 %v3769_v2, %v3769_v2  ;;  %v1082_v61 = vpack.c.bf16 %v3771_v3, %v3771_v3  ;;  %v1083_v18 = vpack.c.bf16 %v3773_v27, %v3773_v27 }
 0x473   : > { %v1084_v17 = vpack.c.bf16 %v3775_v4, %v3775_v4  ;;  %v1085_v9 = vpack.c.bf16 %v3777_v40, %v3777_v40  ;;  %v1100_v46 = vunpack.c.l.b16 %v1079_v15  ;;  %v1086_v20 = vpack.c.bf16 %v3779_v14, %v3779_v14 }
 0x474   : > { %v1101_v42 = vunpack.c.l.b16 %v1080_v41  ;;  %v1102_v23 = vunpack.c.l.b16 %v1081_v57  ;;  %v1103_v19 = vunpack.c.l.b16 %v1082_v61  ;;  %v1104_v36 = vunpack.c.l.b16 %v1083_v18 }
 0x475   : > { %v1105_v24 = vunpack.c.l.b16 %v1084_v17  ;;  %v1106_v26 = vunpack.c.l.b16 %v1085_v9  ;;  %v1107_v33 = vunpack.c.l.b16 %v1086_v20  ;;  %v3206_v18 = vmov 1966171168  }
 0x476   : > { %v1108_v28 = vrot.slane %v1101_v42, 7  ;;  %v1111_v29 = vrot.slane %v1102_v23, 6  ;;  %v1114_v30 = vrot.slane %v1103_v19, 5  ;;  %v1117_v34 = vrot.slane %v1104_v36, 4 }
 0x477   : > { %v1120_v38 = vrot.slane %v1105_v24, 3  ;;  %v1123_v45 = vrot.slane %v1106_v26, 2  ;;  %v1126_v49 = vrot.slane %v1107_v33, 1 }
 0x478   : > { %v1110_v37 = vsel %vm1109_vm2, %v1108_v28, %v1100_v46 }
 0x479   : > { %v1113_v43 = vsel %vm1112_vm3, %v1111_v29, %v1110_v37 }
 0x47a   : > { %v1116_v48 = vsel %vm1115_vm4, %v1114_v30, %v1113_v43 }
 0x47b   : > { %v1119_v53 = vsel %vm1118_vm5, %v1117_v34, %v1116_v48 }
 0x47c   : > { %v1122_v54 = vsel %vm1121_vm6, %v1120_v38, %v1119_v53 }
 0x47d   : > { %v1125_v56 = vsel %vm1124_vm7, %v1123_v45, %v1122_v54 }
 0x47e   : > { %v1128_v47 = vsel %vm1127_vm8, %v1126_v49, %v1125_v56 }
 0x47f   : > { %v1129_v59 = vpack.c.b16 %v1128_v47, %v1128_v47 }
 0x481   : > { %2705 = vmatmul.mubr.msk.bf16.vlgmr.msra.gmra.mrb[8].mxu1 %vm425_vm0, %v1129_v59 }
 0x482   : > { %2709 = vmatpush3.bf16.msra.mxu1 %v3706_v51  ;;  %v1297_v51 = vunpack.c.l.s4 %v3206_v18 }
 0x483   : > { %2710 = vmatprep.subr.bf16.mxu1 %v2851_v52 }
 0x484   : > { %v1298_v17 = vunpack.c.0.s8 %v1297_v51 }
 0x486   : > { %2711 = vmatpush3.bf16.msra.mxu1 %v2851_v52  ;;  %v1301_v46 = vsub.s32 %v1298_v17, %v3499_v21 }
 0x4c9   : > { %v1198_v62 = vpop.permute.xlu1 %1197 }
 0x4ca   : > { %2712 = vmatprep.mubr.msk.bf16.mxu1 %vm425_vm0, %v1198_v62 }
 0x4cd   : > { %v1200_v63 = vpop.permute.xlu1 %1199 }
 0x4ce   : > { %2713 = vmatmul.mubr.msk.bf16.vlgmr.msra.gmra.mrb[12].mxu1 %vm425_vm0, %v1200_v63 }
 0x4d1   : > { %v1202_v0 = vpop.permute.xlu0 %1201 }
 0x4d2   : > { %2716 = vmatprep.mubr.msk.bf16.mxu1 %vm425_vm0, %v1202_v0 }
 0x4d5   : > { %v1204_v1 = vpop.permute.xlu1 %1203  ;;  %v1143_v9 = vpop.permute.xlu0 %1142 }
 0x4d6   : > { %2717 = vmatmul.mubr.msk.bf16.gmra.mrb[16].mxu1 %vm425_vm0, %v1204_v1 }
 0x554   : > { %v1182_v15 = vpop.f32.mrb[8].mxu1 }
 0x555   : > { %v2706_v41 = vpop.f32.mrb[9].mxu1  ;;  %v1183_v20 = vadd.f32 %v1182_v15, %v1143_v9 }
 0x556   : > { %v1185_v57 = vpop.f32.mrb[10].mxu1 }
 0x557   : > { %v2707_v61 = vpop.f32.mrb[11].mxu1  ;;  %v1302_v42 = vrot.slane %v1183_v20, %v1301_v46  ;;  %v1295_v19 = vcombine.high %v1183_v20, %v1183_v20 }
 0x559   : > { %v1310_v23 = vcombine.high %v1302_v42, %v1302_v42  ;;  %v1318_v24 = vrot.slane %v1302_v42, %v1301_v46  ;;  %v1309_v26 = vrot.slane %v1295_v19, %v1301_v46 }
 0x55b   : > { %v1332_v36 = vrot.slane %v1310_v23, %v1301_v46  ;;  %v1340_v33 = vcombine.high %v1318_v24, %v1318_v24  ;;  %v1311_v34 = vcombine.high %v1309_v26, %v1309_v26  ;;  %v3806_v43 = vrot.slane %v1318_v24, %v3502_v22 }
 0x55c   : > { %v1325_v59 = vrot.slane %v1309_v26, %v1301_v46 }
 0x55d   : > { %v1342_v29 = vcombine.high %v1332_v36, %v1332_v36  ;;  %v3813_v54 = vrot.slane %v1332_v36, %v3502_v22  ;;  %v3819_v47 = vrot.slane %v1340_v33, %v3502_v22  ;;  %v1339_v0 = vrot.slane %v1311_v34, %v1301_v46 }
 0x55e   : > { %v3827_v61 = vrot.slane %v1325_v59, %v3502_v22  ;;  %v1341_v9 = vcombine.high %v1325_v59, %v1325_v59 }
 0x55f   : > { %v3816_v56 = vrot.slane %v1342_v29, %v3502_v22  ;;  %v1343_v20 = vcombine.high %v1339_v0, %v1339_v0  ;;  %v3833_v23 = vrot.slane %v1339_v0, %v3502_v22 }
 0x560   : > { %v3841_v29 = vrot.slane %v1341_v9, %v3502_v22 }
 0x5a1   : > { %v2714_v28 = vpop.f32.mrb[12].mxu1 }
 0x5a2   : > { %v1263_v30 = vpop.f32.mrb[13].mxu1  ;;  %v1272_v21 = vadd.f32 %v2714_v28, %v3758_v50 }
 0x5a3   : > { %v1264_v37 = vadd.f32 %v3758_v50, %v1263_v30  ;;  %v2715_v38 = vpop.f32.mrb[14].mxu1  ;;  %v3844_v30 = vrot.slane %v1343_v20, %v3502_v22 }
 0x5a4   : > { %v1275_v45 = vadd.f32 %v2715_v38, %v3758_v50  ;;  %v1266_v48 = vpop.f32.mrb[15].mxu1  ;;  %v1386_v1 = vmul.f32 %v3819_v47, %v1272_v21 }
 0x5a5   : > { %v1267_v49 = vadd.f32 %v3758_v50, %v1266_v48  ;;  %v1384_v53 = vmul.f32 %v3806_v43, %v1264_v37 }
 0x5a6   : > { %v1387_v63 = vmul.f32 %v3816_v56, %v1275_v45  ;;  %v1398_v46 = vsel %vm425_vm0, %v1386_v1, 0.0 }
 0x5a7   : > { %v1392_v52 = vsel %vm425_vm0, %v1384_v53, 0.0  ;;  %v1385_v62 = vmul.f32 %v3813_v54, %v1267_v49 }
 0x5a8   : > { %1393 = vadd.xlane.f32.xlu1 %v1392_v52  ;;  %v1401_v17 = vsel %vm425_vm0, %v1387_v63, 0.0 }
 0x5a9   : > { %v2718_v15 = vpop.f32.mrb[16].mxu1  ;;  %v1395_v41 = vsel %vm425_vm0, %v1385_v62, 0.0 }
 0x5aa   : > { %v1279_v57 = vpop.f32.mrb[17].mxu1  ;;  %1396 = vadd.xlane.f32.xlu0 %v1395_v41  ;;  %v1288_v19 = vadd.f32 %v2718_v15, %v3758_v50 }
 0x5ab   : > { %v1280_v18 = vadd.f32 %v3758_v50, %v1279_v57  ;;  %v2719_v51 = vpop.f32.mrb[18].mxu1 }
 0x5ac   : > { %v1282_v42 = vpop.f32.mrb[19].mxu1  ;;  %1402 = vadd.xlane.f32.xlu1 %v1401_v17  ;;  %v1291_v36 = vadd.f32 %v2719_v51, %v3758_v50  ;;  %v1390_v37 = vmul.f32 %v3841_v29, %v1288_v19 }
 0x5ad   : > { %v1283_v24 = vadd.f32 %v3758_v50, %v1282_v42  ;;  %v1388_v26 = vmul.f32 %v3827_v61, %v1280_v18 }
 0x5ae   : > { %1399 = vadd.xlane.f32.xlu0 %v1398_v46  ;;  %v1391_v38 = vmul.f32 %v3844_v30, %v1291_v36  ;;  %v1410_v21 = vsel %vm425_vm0, %v1390_v37, 0.0 }
 0x5af   : > { %v1389_v28 = vmul.f32 %v3833_v23, %v1283_v24  ;;  %v1404_v33 = vsel %vm425_vm0, %v1388_v26, 0.0 }
 0x5b0   : > { %v1413_v45 = vsel %vm425_vm0, %v1391_v38, 0.0 }
 0x5b1   : > { %v1407_v34 = vsel %vm425_vm0, %v1389_v28, 0.0 }
 0x5b2   : > { %1405 = vadd.xlane.f32.xlu0 %v1404_v33  ;;  %1408 = vadd.xlane.f32.xlu1 %v1407_v34 }
 0x5b6   : > { %1411 = vadd.xlane.f32.xlu0 %v1410_v21  ;;  %1414 = vadd.xlane.f32.xlu1 %v1413_v45 }
 0x635   : > { %v1394_v48 = vpop.xlane.xlu1 %1393 }
 0x636   : > { %v1416_v49 = vmul.f32 0.17677669, %v1394_v48 }
 0x637   : > { %v1397_v53 = vpop.xlane.xlu0 %1396 }
 0x638   : > { %v1424_v59 = vrot.slane %v1416_v49, 4  ;;  %v1417_v52 = vmul.f32 0.17677669, %v1397_v53 }
 0x639   : > { %v1403_v62 = vpop.xlane.xlu1 %1402 }
 0x63a   : > { %v1425_v63 = vmax.f32 %v1416_v49, %v1424_v59  ;;  %v1430_v0 = vrot.slane %v1417_v52, 4  ;;  %v1419_v1 = vmul.f32 0.17677669, %v1403_v62 }
 0x63b   : > { %v1400_v15 = vpop.xlane.xlu0 %1399 }
 0x63c   : > { %v1426_v41 = vrot.slane %v1425_v63, 2  ;;  %v1431_v57 = vmax.f32 %v1417_v52, %v1430_v0  ;;  %v1442_v18 = vrot.slane %v1419_v1, 4  ;;  %v1418_v51 = vmul.f32 0.17677669, %v1400_v15 }
 0x63e   : > { %v1427_v17 = vmax.f32 %v1425_v63, %v1426_v41  ;;  %v1432_v9 = vrot.slane %v1431_v57, 2  ;;  %v1443_v20 = vmax.f32 %v1419_v1, %v1442_v18  ;;  %v1436_v42 = vrot.slane %v1418_v51, 4 }
 0x63f   : > { %v1406_v46 = vpop.xlane.xlu0 %1405  ;;  %v1409_v19 = vpop.xlane.xlu1 %1408 }
 0x640   : > { %v1428_v36 = vrot.slane %v1427_v17, 1  ;;  %v1433_v24 = vmax.f32 %v1431_v57, %v1432_v9  ;;  %v1444_v26 = vrot.slane %v1443_v20, 2  ;;  %v1437_v28 = vmax.f32 %v1418_v51, %v1436_v42 }
 0x641   : > { %v1420_v33 = vmul.f32 0.17677669, %v1406_v46  ;;  %v1421_v34 = vmul.f32 0.17677669, %v1409_v19 }
 0x642   : > { %v1429_v37 = vmax.f32 %v1427_v17, %v1428_v36  ;;  %v1434_v38 = vrot.slane %v1433_v24, 1  ;;  %v1445_v21 = vmax.f32 %v1443_v20, %v1444_v26  ;;  %v1438_v45 = vrot.slane %v1437_v28, 2 }
 0x643   : > { %v1448_v48 = vrot.slane %v1420_v33, 4  ;;  %v1454_v53 = vrot.slane %v1421_v34, 4  ;;  %v1412_v59 = vpop.xlane.xlu0 %1411  ;;  %v1415_v62 = vpop.xlane.xlu1 %1414 }
 0x644   : > { %v1472_v63 = vsub.f32 %v1416_v49, %v1429_v37  ;;  %v1435_v0 = vmax.f32 %v1433_v24, %v1434_v38  ;;  %v1446_v15 = vrot.slane %v1445_v21, 1  ;;  %v1439_v41 = vmax.f32 %v1437_v28, %v1438_v45 }
 0x645   : > { %v1449_v18 = vmax.f32 %v1420_v33, %v1448_v48  ;;  %v1455_v13 = vmax.f32 %v1421_v34, %v1454_v53  ;;  %v1422_v11 = vmul.f32 0.17677669, %v1412_v59  ;;  %v1423_v57 = vmul.f32 0.17677669, %v1415_v62 }
 0x646   : > { %v1480_v9 = vmul.f32 1.442695, %v1472_v63  ;;  %v1473_v42 = vsub.f32 %v1417_v52, %v1435_v0  ;;  %v1447_v46 = vmax.f32 %v1445_v21, %v1446_v15  ;;  %v1440_v19 = vrot.slane %v1439_v41, 1 }
 0x647   : > { %v1450_v17 = vrot.slane %v1449_v18, 2  ;;  %v1456_v36 = vrot.slane %v1455_v13, 2  ;;  %v1460_v20 = vrot.slane %v1422_v11, 4  ;;  %v1466_v26 = vrot.slane %v1423_v57, 4 }
 0x648   : > { %2908 = vpow2.f32 %v1480_v9  ;;  %v1482_v12 = vmul.f32 1.442695, %v1473_v42  ;;  %v1475_v10 = vsub.f32 %v1419_v1, %v1447_v46  ;;  %v1441_v6 = vmax.f32 %v1439_v41, %v1440_v19 }
 0x649   : > { %v1451_v49 = vmax.f32 %v1449_v18, %v1450_v17  ;;  %v1457_v24 = vmax.f32 %v1455_v13, %v1456_v36  ;;  %v1461_v37 = vmax.f32 %v1422_v11, %v1460_v20  ;;  %v1467_v28 = vmax.f32 %v1423_v57, %v1466_v26 }
 0x64a   : > { %2910 = vpow2.f32 %v1482_v12  ;;  %v1486_v38 = vmul.f32 1.442695, %v1475_v10  ;;  %v1474_v45 = vsub.f32 %v1418_v51, %v1441_v6 }
 0x64b   : > { %v1452_v48 = vrot.slane %v1451_v49, 1  ;;  %v1458_v53 = vrot.slane %v1457_v24, 1  ;;  %v1462_v52 = vrot.slane %v1461_v37, 2  ;;  %v1468_v21 = vrot.slane %v1467_v28, 2 }
 0x64c   : > { %2912 = vpow2.f32 %v1486_v38  ;;  %v1484_v59 = vmul.f32 1.442695, %v1474_v45 }
 0x64d   : > { %v1453_v62 = vmax.f32 %v1451_v49, %v1452_v48  ;;  %v1459_v63 = vmax.f32 %v1457_v24, %v1458_v53  ;;  %v1463_v0 = vmax.f32 %v1461_v37, %v1462_v52  ;;  %v1469_v15 = vmax.f32 %v1467_v28, %v1468_v21 }
 0x64e   : > { %2914 = vpow2.f32 %v1484_v59 }
 0x64f   : > { %v1476_v1 = vsub.f32 %v1420_v33, %v1453_v62  ;;  %v1477_v41 = vsub.f32 %v1421_v34, %v1459_v63  ;;  %v1464_v18 = vrot.slane %v1463_v0, 1  ;;  %v1470_v13 = vrot.slane %v1469_v15, 1 }
 0x651   : > { %v1488_v9 = vmul.f32 1.442695, %v1476_v1  ;;  %v1490_v42 = vmul.f32 1.442695, %v1477_v41  ;;  %v1465_v12 = vmax.f32 %v1463_v0, %v1464_v18  ;;  %v1471_v10 = vmax.f32 %v1469_v15, %v1470_v13 }
 0x652   : > { %v3852_v6 = vpop.eup %2908 }
 0x653   : > { %2916 = vpow2.f32 %v1488_v9  ;;  %v1478_v51 = vsub.f32 %v1422_v11, %v1465_v12  ;;  %v1479_v46 = vsub.f32 %v1423_v57, %v1471_v10  ;;  %v1496_v19 = vrot.slane %v3852_v6, 4 }
 0x654   : > { %v3855_v17 = vpop.eup %2910  ;;  %2918 = vpow2.f32 %v1490_v42 }
 0x655   : > { %v1492_v36 = vmul.f32 1.442695, %v1478_v51  ;;  %v1494_v20 = vmul.f32 1.442695, %v1479_v46  ;;  %v1497_v33 = vadd.f32 %v3852_v6, %v1496_v19  ;;  %v1502_v34 = vrot.slane %v3855_v17, 4 }
 0x656   : > { %v3859_v26 = vpop.eup %2912 }
 0x657   : > { %2920 = vpow2.f32 %v1492_v36  ;;  %v1498_v49 = vrot.slane %v1497_v33, 2  ;;  %v1503_v24 = vadd.f32 %v3855_v17, %v1502_v34  ;;  %v1514_v11 = vrot.slane %v3859_v26, 4 }
 0x658   : > { %v3863_v57 = vpop.eup %2914  ;;  %2922 = vpow2.f32 %v1494_v20 }
 0x659   : > { %v1499_v37 = vadd.f32 %v1498_v49, %v1497_v33  ;;  %v1504_v28 = vrot.slane %v1503_v24, 2  ;;  %v1515_v38 = vadd.f32 %v3859_v26, %v1514_v11  ;;  %v1508_v45 = vrot.slane %v3863_v57, 4 }
 0x65b   : > { %v1500_v48 = vrot.slane %v1499_v37, 1  ;;  %v1505_v53 = vadd.f32 %v1504_v28, %v1503_v24  ;;  %v1516_v52 = vrot.slane %v1515_v38, 2  ;;  %v1509_v21 = vadd.f32 %v3863_v57, %v1508_v45 }
 0x65d   : > { %v3868_v59 = vpop.eup %2916  ;;  %v1501_v62 = vadd.f32 %v1500_v48, %v1499_v37  ;;  %v1506_v63 = vrot.slane %v1505_v53, 1  ;;  %v1517_v0 = vadd.f32 %v1516_v52, %v1515_v38  ;;  %v1510_v15 = vrot.slane %v1509_v21, 2 }
 0x65e   : > { %v3870_v1 = vpop.eup %2918  ;;  %v1520_v41 = vrot.slane %v3868_v59, 4 }
 0x65f   : > { %2924 = vrcp.f32 %v1501_v62  ;;  %v1507_v18 = vadd.f32 %v1506_v63, %v1505_v53  ;;  %v1518_v13 = vrot.slane %v1517_v0, 1  ;;  %v1511_v9 = vadd.f32 %v1510_v15, %v1509_v21 }
 0x660   : > { %v1526_v42 = vrot.slane %v3870_v1, 4  ;;  %v1521_v12 = vadd.f32 %v3868_v59, %v1520_v41 }
 0x661   : > { %v3875_v10 = vpop.eup %2920  ;;  %2926 = vrcp.f32 %v1507_v18  ;;  %v1519_v51 = vadd.f32 %v1518_v13, %v1517_v0  ;;  %v1512_v46 = vrot.slane %v1511_v9, 1  ;;  %v1579_v0 = vrot.slane %v3765_v25, %v3502_v22 }
 0x662   : > { %v2923_v19 = vpop.eup %2922  ;;  %v1527_v36 = vadd.f32 %v3870_v1, %v1526_v42  ;;  %v1522_v20 = vrot.slane %v1521_v12, 2  ;;  %v1532_v33 = vrot.slane %v3875_v10, 4  ;;  %v1583_v42 = vrot.slane %v3767_v35, %v3502_v22 }
 0x663   : > { %2928 = vrcp.f32 %v1519_v51  ;;  %v1513_v34 = vadd.f32 %v1512_v46, %v1511_v9  ;;  %v1538_v49 = vrot.slane %v2923_v19, 4 }
 0x664   : > { %v1528_v24 = vrot.slane %v1527_v36, 2  ;;  %v1523_v11 = vadd.f32 %v1522_v20, %v1521_v12  ;;  %v1533_v37 = vadd.f32 %v3875_v10, %v1532_v33 }
 0x665   : > { %2930 = vrcp.f32 %v1513_v34  ;;  %v1539_v28 = vadd.f32 %v2923_v19, %v1538_v49  ;;  %v1591_v34 = vrot.slane %v3771_v3, %v3502_v22  ;;  %v1595_v3 = vrot.slane %v3773_v27, %v3502_v22 }
 0x666   : > { %v1529_v38 = vadd.f32 %v1528_v24, %v1527_v36  ;;  %v1524_v45 = vrot.slane %v1523_v11, 1  ;;  %v1534_v48 = vrot.slane %v1533_v37, 2  ;;  %v1587_v24 = vrot.slane %v3769_v2, %v3502_v22 }
 0x667   : > { %v1540_v53 = vrot.slane %v1539_v28, 2  ;;  %v1607_v27 = vrot.slane %v3779_v14, %v3502_v22 }
 0x668   : > { %v1530_v52 = vrot.slane %v1529_v38, 1  ;;  %v1525_v21 = vadd.f32 %v1524_v45, %v1523_v11  ;;  %v1535_v62 = vadd.f32 %v1534_v48, %v1533_v37 }
 0x669   : > { %v2925_v63 = vpop.eup %2924  ;;  %v1541_v15 = vadd.f32 %v1540_v53, %v1539_v28 }
 0x66a   : > { %v1552_v41 = vmul.f32 %v2925_v63, %v3852_v6  ;;  %v1531_v18 = vadd.f32 %v1530_v52, %v1529_v38  ;;  %2932 = vrcp.f32 %v1525_v21  ;;  %v1536_v13 = vrot.slane %v1535_v62, 1  ;;  %v2853_v63 = vld [vmem:[#allocation6 + $0x40] ss:$24 sps:$4 sm:$0xff]  }
 0x66b   : > { %v2927_v9 = vpop.eup %2926  ;;  %v1542_v12 = vrot.slane %v1541_v15, 1 }
 0x66c   : > { %v1608_v51 = vmul.f32 %v1579_v0, %v1552_v41  ;;  %v1553_v46 = vmul.f32 %v2927_v9, %v3855_v17  ;;  %2934 = vrcp.f32 %v1531_v18  ;;  %v1537_v36 = vadd.f32 %v1536_v13, %v1535_v62 }
 0x66d   : > { %v2929_v20 = vpop.eup %2928  ;;  %v1543_v33 = vadd.f32 %v1542_v12, %v1541_v15 }
 0x66e   : > { %1624 = vrot.lane.b32.xlu0 %v1608_v51, %s3202_s23  ;;  %v1609_v25 = vmul.f32 %v1583_v42, %v1553_v46  ;;  %v1555_v6 = vmul.f32 %v2929_v20, %v3859_v26  ;;  %2936 = vrcp.f32 %v1537_v36 }
 0x66f   : > { %v2931_v49 = vpop.eup %2930  ;;  %2938 = vrcp.f32 %v1543_v33 }
 0x670   : > { %1626 = vrot.lane.b32.xlu1 %v1609_v25, %s3202_s23  ;;  %v1611_v35 = vmul.f32 %v1591_v34, %v1555_v6  ;;  %v1554_v17 = vmul.f32 %v2931_v49, %v3863_v57  ;;  %v1599_v57 = vrot.slane %v3775_v4, %v3502_v22  ;;  %v2852_v4 = vld [vmem:[#allocation6 + $0x10] ss:$24 sps:$4 sm:$0xff]   ;;  %v1563_v14 = vsub.f32 1.0, %v1555_v6 }
 0x671   : > { %2720 = vmatprep.subr.bf16.mxu1 %v2852_v4 }
 0x672   : > { %1630 = vrot.lane.b32.xlu0 %v1611_v35, %s3202_s23  ;;  %v1610_v11 = vmul.f32 %v1587_v24, %v1554_v17  ;;  %2721 = vmatpush3.bf16.msra.mxu1 %v2852_v4  ;;  %v1562_v15 = vsub.f32 1.0, %v1554_v17  ;;  %v1571_v12 = vmul.f32 %v1563_v14, %v3737_v32  ;;  %v2854_v32 = vld [vmem:[%s4274_s5] sm:$0xff]   ;;  %v2855_v24 = vld [vmem:[%s4274_s5 + $0x8] sm:$0xff]  }
 0x673   : > { %2722 = vmatprep.subr.bf16.mxu1 %v2853_v63  ;;  %2732 = vmatprep.subr.bf16.mxu0 %v2854_v32 }
 0x674   : > { %v2933_v37 = vpop.eup %2932  ;;  %1628 = vrot.lane.b32.xlu1 %v1610_v11, %s3202_s23  ;;  %v1570_v51 = vmul.f32 %v1562_v15, %v3734_v31  ;;  %2733 = vmatpush3.bf16.msra.mxu0 %v2854_v32 }
 0x675   : > { %v1556_v26 = vmul.f32 %v2933_v37, %v3868_v59  ;;  %v1603_v59 = vrot.slane %v3777_v40, %v3502_v22  ;;  %v1561_v40 = vsub.f32 1.0, %v1553_v46  ;;  %2734 = vmatprep.subr.bf16.mxu0 %v2855_v24 }
 0x676   : > { %v2935_v28 = vpop.eup %2934  ;;  %2723 = vmatpush3.bf16.msra.mxu1 %v2853_v63 }
 0x677   : > { %v1557_v38 = vmul.f32 %v2935_v28, %v3870_v1  ;;  %v1612_v45 = vmul.f32 %v1595_v3, %v1556_v26  ;;  %v1569_v22 = vmul.f32 %v1561_v40, %v3713_v39  ;;  %v1564_v36 = vsub.f32 1.0, %v1556_v26 }
 0x678   : > { %v2937_v48 = vpop.eup %2936  ;;  %2735 = vmatpush3.bf16.msra.mxu0 %v2855_v24 }
 0x679   : > { %v2939_v2 = vpop.eup %2938  ;;  %v1613_v53 = vmul.f32 %v1599_v57, %v1557_v38  ;;  %1632 = vrot.lane.b32.xlu1 %v1612_v45, %s3202_s23  ;;  %v1558_v52 = vmul.f32 %v2937_v48, %v3875_v10  ;;  %v1560_v10 = vsub.f32 1.0, %v1552_v41  ;;  %v1565_v20 = vsub.f32 1.0, %v1557_v38  ;;  %v2856_v38 = vld [vmem:[%s4274_s5 + $0x10] sm:$0xff]  }
 0x67a   : > { %v1559_v21 = vmul.f32 %v2939_v2, %v2923_v19  ;;  %v1572_v31 = vmul.f32 %v1564_v36, %v3743_v44  ;;  %2736 = vmatprep.subr.bf16.mxu0 %v2856_v38 }
 0x67b   : > { %1634 = vrot.lane.b32.xlu0 %v1613_v53, %s3202_s23  ;;  %v1614_v1 = vmul.f32 %v1603_v59, %v1558_v52  ;;  %v1568_v0 = vmul.f32 %v1560_v10, %v3710_v16  ;;  %v1566_v25 = vsub.f32 1.0, %v1558_v52  ;;  %v1573_v34 = vmul.f32 %v1565_v20, %v3746_v60 }
 0x67c   : > { %v1615_v62 = vmul.f32 %v1607_v27, %v1559_v21  ;;  %v1567_v35 = vsub.f32 1.0, %v1559_v21  ;;  %2737 = vmatpush3.bf16.msra.mxu0 %v2856_v38 }
 0x67d   : > { %1636 = vrot.lane.b32.xlu1 %v1614_v1, %s3202_s23  ;;  %v1574_v44 = vmul.f32 %v1566_v25, %v3752_v55 }
 0x67e   : > { %v1575_v26 = vmul.f32 %v1567_v35, %v3755_v58  ;;  %v2857_v58 = vld [vmem:[%s4274_s5 + $0x18] sm:$0xff]  }
 0x67f   : > { %1638 = vrot.lane.b32.xlu0 %v1615_v62, %s3202_s23  ;;  %2738 = vmatprep.subr.bf16.mxu0 %v2857_v58 }
 0x680   : > { %2739 = vmatpush3.bf16.msra.mxu0 %v2857_v58 }
 0x6e0   : > { %v1625_v19 = vpop.permute.xlu0 %1624 }
 0x6e1   : > { %v3913_v13 = vadd.f32 %v1625_v19, %v1568_v0 }
 0x6e2   : > { %v1627_v18 = vpop.permute.xlu1 %1626 }
 0x6e3   : > { %v3915_v9 = vadd.f32 %v1627_v18, %v1569_v22 }
 0x6e4   : > { %v1631_v42 = vpop.permute.xlu0 %1630 }
 0x6e5   : > { %v1656_v41 = vpack.c.bf16 %v3915_v9, %v3913_v13  ;;  %v3921_v16 = vadd.f32 %v1631_v42, %v1571_v12 }
 0x6e6   : > { %v1629_v46 = vpop.permute.xlu1 %1628 }
 0x6e7   : > { %v3923_v39 = vadd.f32 %v1629_v46, %v1570_v51  ;;  %1664 = vrot.lane.b32.xlu1 %v1656_v41, %s3202_s23 }
 0x6e9   : > { %v1657_v33 = vpack.c.bf16 %v3921_v16, %v3923_v39 }
 0x6eb   : > { %v1633_v6 = vpop.permute.xlu1 %1632  ;;  %1666 = vrot.lane.b32.xlu0 %v1657_v33, %s3202_s23 }
 0x6ec   : > { %v3934_v49 = vadd.f32 %v1633_v6, %v1572_v31 }
 0x6ed   : > { %v1635_v17 = vpop.permute.xlu0 %1634 }
 0x6ee   : > { %v3939_v11 = vadd.f32 %v1635_v17, %v1573_v34 }
 0x6ef   : > { %v1637_v37 = vpop.permute.xlu1 %1636 }
 0x6f0   : > { %v3943_v3 = vadd.f32 %v1637_v37, %v1574_v44  ;;  %v1658_v60 = vpack.c.bf16 %v3939_v11, %v3934_v49 }
 0x6f1   : > { %v1639_v28 = vpop.permute.xlu0 %1638 }
 0x6f2   : > { %v3950_v57 = vadd.f32 %v1639_v28, %v1575_v26  ;;  %1668 = vrot.lane.b32.xlu1 %v1658_v60, %s3202_s23 }
 0x6f4   : > { %v1659_v55 = vpack.c.bf16 %v3950_v57, %v3943_v3 }
 0x6f6   : > { %2045 = vrot.lane.b32.xlu1 %v3913_v13, %s3207_s12  ;;  %1670 = vrot.lane.b32.xlu0 %v1659_v55, %s3202_s23 }
 0x6fa   : > { %2049 = vrot.lane.b32.xlu1 %v3923_v39, %s3207_s12  ;;  %2047 = vrot.lane.b32.xlu0 %v3915_v9, %s3207_s12 }
 0x6fe   : > { %2053 = vrot.lane.b32.xlu1 %v3934_v49, %s3207_s12  ;;  %2051 = vrot.lane.b32.xlu0 %v3921_v16, %s3207_s12 }
 0x702   : > { %2057 = vrot.lane.b32.xlu1 %v3943_v3, %s3207_s12  ;;  %2055 = vrot.lane.b32.xlu0 %v3939_v11, %s3207_s12 }
 0x706   : > { %1684 = vrot.lane.b32.xlu1 %v3758_v50, %s3207_s12  ;;  %2059 = vrot.lane.b32.xlu0 %v3950_v57, %s3207_s12 }
 0x70a   : > { %1766 = vrot.lane.b32.xlu1 %v3813_v54, %s3207_s12  ;;  %1764 = vrot.lane.b32.xlu0 %v3806_v43, %s3207_s12 }
 0x70e   : > { %1770 = vrot.lane.b32.xlu1 %v3816_v56, %s3207_s12  ;;  %1768 = vrot.lane.b32.xlu0 %v3819_v47, %s3207_s12 }
 0x712   : > { %1774 = vrot.lane.b32.xlu1 %v3833_v23, %s3207_s12  ;;  %1772 = vrot.lane.b32.xlu0 %v3827_v61, %s3207_s12 }
 0x716   : > { %1778 = vrot.lane.b32.xlu1 %v3844_v30, %s3207_s12  ;;  %1776 = vrot.lane.b32.xlu0 %v3841_v29, %s3207_s12 }
 0x759   : > { %v1665_v45 = vpop.permute.xlu1 %1664 }
 0x75a   : > { %2724 = vmatprep.mubr.msk.bf16.mxu1 %vm425_vm0, %v1665_v45 }
 0x75d   : > { %v1667_v50 = vpop.permute.xlu0 %1666 }
 0x75e   : > { %2725 = vmatmul.mubr.msk.bf16.vlgmr.msra.gmra.mrb[20].mxu1 %vm425_vm0, %v1667_v50 }
 0x764   : > { %v1669_v54 = vpop.permute.xlu1 %1668 }
 0x765   : > { %2728 = vmatprep.mubr.msk.bf16.mxu1 %vm425_vm0, %v1669_v54 }
 0x768   : > { %v1671_v43 = vpop.permute.xlu0 %1670  ;;  %v2046_v56 = vpop.permute.xlu1 %2045 }
 0x769   : > { %2070 = vst.msk [vmem:[#allocation2] sm:$0xff] %vm2069_vm9, %v2046_v56  ;;  %2729 = vmatmul.mubr.msk.bf16.gmra.mrb[24].mxu1 %vm425_vm0, %v1671_v43 }
 0x76c   : > { %v2048_v47 = vpop.permute.xlu0 %2047  ;;  %v2050_v61 = vpop.permute.xlu1 %2049 }
 0x76d   : > { %2071 = vst.msk [vmem:[#allocation2 + $0x8] sm:$0xff] %vm2069_vm9, %v2048_v47  ;;  %2072 = vst.msk [vmem:[#allocation2 + $0x10] sm:$0xff] %vm2069_vm9, %v2050_v61 }
 0x770   : > { %v2052_v23 = vpop.permute.xlu0 %2051  ;;  %v2054_v29 = vpop.permute.xlu1 %2053  ;;  %v2078_v2 = vld [vmem:[#allocation2] sm:$0xff] }
 0x771   : > { %2073 = vst.msk [vmem:[#allocation2 + $0x18] sm:$0xff] %vm2069_vm9, %v2052_v23  ;;  %2074 = vst.msk [vmem:[#allocation2 + $0x20] sm:$0xff] %vm2069_vm9, %v2054_v29 }
 0x774   : > { %v2056_v30 = vpop.permute.xlu0 %2055  ;;  %v2058_v48 = vpop.permute.xlu1 %2057  ;;  %v2079_v53 = vld [vmem:[#allocation2 + $0x8] sm:$0xff]  ;;  %v2080_v21 = vld [vmem:[#allocation2 + $0x10] sm:$0xff] }
 0x775   : > { %2075 = vst.msk [vmem:[#allocation2 + $0x28] sm:$0xff] %vm2069_vm9, %v2056_v30  ;;  %2076 = vst.msk [vmem:[#allocation2 + $0x30] sm:$0xff] %vm2069_vm9, %v2058_v48  ;;  %v2086_v52 = vpack.c.bf16 %v2079_v53, %v2078_v2 }
 0x777   : > { %2740 = vmatprep.mubr.msk.bf16.mxu0 %vm2120_vm10, %v2086_v52 }
 0x778   : > { %v2060_v59 = vpop.permute.xlu0 %2059  ;;  %v2081_v27 = vld [vmem:[#allocation2 + $0x18] sm:$0xff]  ;;  %v2082_v62 = vld [vmem:[#allocation2 + $0x20] sm:$0xff]  ;;  %v1685_v0 = vpop.permute.xlu1 %1684 }
 0x779   : > { %2077 = vst.msk [vmem:[#allocation2 + $0x38] sm:$0xff] %vm2069_vm9, %v2060_v59  ;;  %v2087_v1 = vpack.c.bf16 %v2081_v27, %v2080_v21 }
 0x77b   : > { %2741 = vmatmul.mubr.msk.bf16.vlgmr.msra.gmra.mrb[24].mxu0 %vm2120_vm10, %v2087_v1 }
 0x77c   : > { %v2083_v4 = vld [vmem:[#allocation2 + $0x28] sm:$0xff]  ;;  %v2084_v10 = vld [vmem:[#allocation2 + $0x30] sm:$0xff]  ;;  %v1765_v22 = vpop.permute.xlu0 %1764  ;;  %v1767_v14 = vpop.permute.xlu1 %1766 }
 0x77d   : > { %v2088_v63 = vpack.c.bf16 %v2083_v4, %v2082_v62 }
 0x77f   : > { %2744 = vmatprep.mubr.msk.bf16.mxu0 %vm2120_vm10, %v2088_v63  ;;  %v2594_v63 = vld [vmem:[#allocation8 + $0x5] ss:$0 sm:$0xff] }
 0x780   : > { %v2085_v40 = vld [vmem:[#allocation2 + $0x38] sm:$0xff]  ;;  %v1769_v12 = vpop.permute.xlu0 %1768  ;;  %v1771_v25 = vpop.permute.xlu1 %1770 }
 0x781   : > { %v2089_v19 = vpack.c.bf16 %v2085_v40, %v2084_v10 }
 0x783   : > { %2745 = vmatmul.mubr.msk.bf16.gmra.mrb[28].mxu0 %vm2120_vm10, %v2089_v19 }
 0x784   : > { %v1773_v24 = vpop.permute.xlu0 %1772  ;;  %v1775_v37 = vpop.permute.xlu1 %1774 }
 0x788   : > { %v1777_v43 = vpop.permute.xlu0 %1776  ;;  %v1779_v23 = vpop.permute.xlu1 %1778 }
 0x831   : > { %v2726_v15 = vpop.f32.mrb[20].mxu1 }
 0x832   : > { %v1742_v18 = vadd.f32 %v2726_v15, %v1685_v0  ;;  %v1733_v42 = vpop.f32.mrb[21].mxu1 }
 0x833   : > { %v1734_v51 = vadd.f32 %v1733_v42, %v1685_v0  ;;  %v2727_v41 = vpop.f32.mrb[22].mxu1 }
 0x834   : > { %v1736_v46 = vpop.f32.mrb[23].mxu1  ;;  %v1790_v36 = vmul.f32 %v1769_v12, %v1742_v18  ;;  %v1745_v33 = vadd.f32 %v2727_v41, %v1685_v0 }
 0x835   : > { %v1737_v20 = vadd.f32 %v1736_v46, %v1685_v0  ;;  %v1788_v31 = vmul.f32 %v1765_v22, %v1734_v51 }
 0x836   : > { %v1802_v32 = vsel %vm425_vm0, %v1790_v36, 0.0  ;;  %v1791_v17 = vmul.f32 %v1771_v25, %v1745_v33 }
 0x837   : > { %1803 = vadd.xlane.f32.xlu0 %v1802_v32  ;;  %v1789_v6 = vmul.f32 %v1767_v14, %v1737_v20  ;;  %v1796_v35 = vsel %vm425_vm0, %v1788_v31, 0.0 }
 0x838   : > { %v1805_v55 = vsel %vm425_vm0, %v1791_v17, 0.0 }
 0x839   : > { %v1799_v34 = vsel %vm425_vm0, %v1789_v6, 0.0 }
 0x83a   : > { %1800 = vadd.xlane.f32.xlu1 %v1799_v34 }
 0x83b   : > { %1797 = vadd.xlane.f32.xlu0 %v1796_v35 }
 0x83c   : > { %v2730_v44 = vpop.f32.mrb[24].mxu1 }
 0x83d   : > { %v1749_v26 = vpop.f32.mrb[25].mxu1  ;;  %v1758_v60 = vadd.f32 %v2730_v44, %v1685_v0 }
 0x83e   : > { %v1750_v28 = vadd.f32 %v1749_v26, %v1685_v0  ;;  %v2731_v38 = vpop.f32.mrb[26].mxu1 }
 0x83f   : > { %v1752_v58 = vpop.f32.mrb[27].mxu1  ;;  %1806 = vadd.xlane.f32.xlu0 %v1805_v55  ;;  %v1761_v45 = vadd.f32 %v2731_v38, %v1685_v0  ;;  %v1794_v61 = vmul.f32 %v1777_v43, %v1758_v60 }
 0x840   : > { %v1753_v50 = vadd.f32 %v1752_v58, %v1685_v0  ;;  %v1792_v54 = vmul.f32 %v1773_v24, %v1750_v28 }
 0x841   : > { %v1795_v30 = vmul.f32 %v1779_v23, %v1761_v45  ;;  %v1814_v48 = vsel %vm425_vm0, %v1794_v61, 0.0 }
 0x842   : > { %v1808_v56 = vsel %vm425_vm0, %v1792_v54, 0.0  ;;  %v1793_v47 = vmul.f32 %v1775_v37, %v1753_v50 }
 0x843   : > { %1809 = vadd.xlane.f32.xlu1 %v1808_v56  ;;  %v1817_v2 = vsel %vm425_vm0, %v1795_v30, 0.0 }
 0x844   : > { %v1811_v29 = vsel %vm425_vm0, %v1793_v47, 0.0 }
 0x845   : > { %1812 = vadd.xlane.f32.xlu0 %v1811_v29 }
 0x847   : > { %1815 = vadd.xlane.f32.xlu1 %v1814_v48 }
 0x849   : > { %1818 = vadd.xlane.f32.xlu0 %v1817_v2 }
 0x84e   : > { %v2742_v53 = vpop.f32.mrb[24].mxu0 }
 0x84f   : > { %v2167_v52 = vpop.f32.mrb[25].mxu0  ;;  %v2176_v10 = vadd.f32 %v2742_v53, %v2594_v63 }
 0x850   : > { %v2743_v59 = vpop.f32.mrb[26].mxu0  ;;  %v2168_v40 = vadd.f32 %v2594_v63, %v2167_v52 }
 0x851   : > { %v2170_v21 = vpop.f32.mrb[27].mxu0  ;;  %v2179_v19 = vadd.f32 %v2743_v59, %v2594_v63  ;;  %v2605_v0 = vmul.f32 -1.442695, %v2176_v10 }
 0x852   : > { %v2603_v22 = vmul.f32 -1.442695, %v2168_v40  ;;  %v2171_v14 = vadd.f32 %v2594_v63, %v2170_v21 }
 0x853   : > { %v2606_v15 = vmul.f32 -1.442695, %v2179_v19  ;;  %2940 = vpow2.f32 %v2605_v0 }
 0x854   : > { %2942 = vpow2.f32 %v2603_v22  ;;  %v2604_v42 = vmul.f32 -1.442695, %v2171_v14 }
 0x855   : > { %2944 = vpow2.f32 %v2606_v15 }
 0x856   : > { %v2746_v27 = vpop.f32.mrb[28].mxu0  ;;  %2946 = vpow2.f32 %v2604_v42 }
 0x857   : > { %v2183_v1 = vpop.f32.mrb[29].mxu0  ;;  %v2192_v12 = vadd.f32 %v2746_v27, %v2594_v63 }
 0x858   : > { %v2747_v62 = vpop.f32.mrb[30].mxu0  ;;  %2262 = vrot.lane.b32.xlu1 %v3913_v13, %s3202_s23  ;;  %v2184_v18 = vadd.f32 %v2594_v63, %v2183_v1 }
 0x859   : > { %v2186_v4 = vpop.f32.mrb[31].mxu0  ;;  %v2195_v41 = vadd.f32 %v2747_v62, %v2594_v63  ;;  %v2609_v36 = vmul.f32 -1.442695, %v2192_v12 }
 0x85a   : > { %v2607_v51 = vmul.f32 -1.442695, %v2184_v18  ;;  %v2187_v46 = vadd.f32 %v2594_v63, %v2186_v4 }
 0x85b   : > { %v2610_v20 = vmul.f32 -1.442695, %v2195_v41 }
 0x85c   : > { %2266 = vrot.lane.b32.xlu1 %v3923_v39, %s3202_s23  ;;  %2948 = vpow2.f32 %v2607_v51  ;;  %v2608_v33 = vmul.f32 -1.442695, %v2187_v46 }
 0x85d   : > { %v2941_v32 = vpop.eup %2940  ;;  %2950 = vpow2.f32 %v2609_v36 }
 0x85e   : > { %v2943_v31 = vpop.eup %2942  ;;  %2952 = vpow2.f32 %v2610_v20  ;;  %v2224_v6 = vadd.f32 1.0, %v2941_v32 }
 0x85f   : > { %2264 = vrot.lane.b32.xlu0 %v3915_v9, %s3202_s23  ;;  %v2945_v25 = vpop.eup %2944  ;;  %2954 = vpow2.f32 %v2608_v33  ;;  %v2222_v34 = vadd.f32 1.0, %v2943_v31 }
 0x860   : > { %2268 = vrot.lane.b32.xlu1 %v3921_v16, %s3202_s23  ;;  %v2947_v35 = vpop.eup %2946  ;;  %v2225_v17 = vadd.f32 1.0, %v2945_v25  ;;  %2956 = vrcp.f32 %v2224_v6 }
 0x861   : > { %2958 = vrcp.f32 %v2222_v34  ;;  %v2223_v44 = vadd.f32 1.0, %v2947_v35 }
 0x862   : > { %2960 = vrcp.f32 %v2225_v17 }
 0x863   : > { %2270 = vrot.lane.b32.xlu0 %v3934_v49, %s3202_s23  ;;  %2962 = vrcp.f32 %v2223_v44 }
 0x864   : > { %2272 = vrot.lane.b32.xlu1 %v3939_v11, %s3202_s23 }
 0x866   : > { %v2949_v24 = vpop.eup %2948 }
 0x867   : > { %2274 = vrot.lane.b32.xlu0 %v3943_v3, %s3202_s23  ;;  %v2226_v26 = vadd.f32 1.0, %v2949_v24  ;;  %v2951_v28 = vpop.eup %2950  ;;  %v4300_v24 = vld [vmem:[#allocation16_spill] sm:$0xff] }
 0x868   : > { %2276 = vrot.lane.b32.xlu1 %v3950_v57, %s3202_s23  ;;  %v2953_v38 = vpop.eup %2952  ;;  %v2228_v43 = vadd.f32 1.0, %v2951_v28 }
 0x869   : > { %v2955_v45 = vpop.eup %2954  ;;  %2964 = vrcp.f32 %v2226_v26  ;;  %v2229_v61 = vadd.f32 1.0, %v2953_v38 }
 0x86a   : > { %v2227_v29 = vadd.f32 1.0, %v2955_v45  ;;  %v4022_v2 = vpop.eup %2956  ;;  %2966 = vrcp.f32 %v2228_v43 }
 0x86b   : > { %v2959_v59 = vpop.eup %2958  ;;  %2968 = vrcp.f32 %v2229_v61  ;;  %v4034_v14 = vmul.f32 %v4022_v2, %v3446_v7  ;;  %v2256_v15 = vsub.f32 1.0, %v4022_v2 }
 0x86c   : > { %v4028_v4 = vpop.eup %2960  ;;  %2970 = vrcp.f32 %v2227_v29  ;;  %v2246_v22 = vmul.f32 %v2959_v59, %v3440_v5  ;;  %v2254_v20 = vsub.f32 1.0, %v2959_v59 }
 0x86d   : > { %v2963_v18 = vpop.eup %2962  ;;  %v4042_v33 = vmul.f32 %v4028_v4, %v3448_v8  ;;  %v2257_v5 = vsub.f32 1.0, %v4028_v4 }
 0x86e   : > { %v2247_v44 = vmul.f32 %v2963_v18, %v4300_v24 }
 0x873   : > { %v4045_v7 = vpop.eup %2964 }
 0x8c4   : > { %v1804_v37 = vpop.xlane.xlu0 %1803 }
 0x8c5   : > { %v1822_v60 = vmul.f32 0.17677669, %v1804_v37  ;;  %v2255_v37 = vsub.f32 1.0, %v2963_v18 }
 0x8c7   : > { %v1840_v55 = vrot.slane %v1822_v60, 4  ;;  %v1801_v58 = vpop.xlane.xlu1 %1800 }
 0x8c8   : > { %v4016_v50 = vmul.f32 0.17677669, %v1801_v58  ;;  %v1798_v54 = vpop.xlane.xlu0 %1797 }
 0x8c9   : > { %v1841_v56 = vmax.f32 %v1822_v60, %v1840_v55  ;;  %v4018_v47 = vmul.f32 0.17677669, %v1798_v54  ;;  %v4301_v54 = vld [vmem:[#allocation17_spill] sm:$0xff] }
 0x8ca   : > { %v1834_v23 = vrot.slane %v4016_v50, 4  ;;  %v2250_v43 = vmul.f32 %v4045_v7, %v4301_v54 }
 0x8cb   : > { %v1842_v30 = vrot.slane %v1841_v56, 2  ;;  %v1828_v48 = vrot.slane %v4018_v47, 4 }
 0x8cc   : > { %v1835_v53 = vmax.f32 %v4016_v50, %v1834_v23  ;;  %v1807_v52 = vpop.xlane.xlu0 %1806 }
 0x8cd   : > { %v1843_v21 = vmax.f32 %v1841_v56, %v1842_v30  ;;  %v1829_v27 = vmax.f32 %v4018_v47, %v1828_v48  ;;  %v4026_v1 = vmul.f32 0.17677669, %v1807_v52  ;;  %v4058_v56 = vpop.eup %2966 }
 0x8ce   : > { %v1836_v62 = vrot.slane %v1835_v53, 2  ;;  %v4061_v30 = vpop.eup %2968 }
 0x8cf   : > { %v1844_v63 = vrot.slane %v1843_v21, 1  ;;  %v1830_v10 = vrot.slane %v1829_v27, 2  ;;  %v1846_v40 = vrot.slane %v4026_v1, 4 }
 0x8d0   : > { %v1837_v19 = vmax.f32 %v1835_v53, %v1836_v62  ;;  %v1810_v0 = vpop.xlane.xlu1 %1809 }
 0x8d1   : > { %v1845_v42 = vmax.f32 %v1843_v21, %v1844_v63  ;;  %v1831_v12 = vmax.f32 %v1829_v27, %v1830_v10  ;;  %v1847_v51 = vmax.f32 %v4026_v1, %v1846_v40  ;;  %v4038_v41 = vmul.f32 0.17677669, %v1810_v0  ;;  %v4067_v21 = vpop.eup %2970 }
 0x8d2   : > { %v1838_v46 = vrot.slane %v1837_v19, 1  ;;  %v1813_v36 = vpop.xlane.xlu0 %1812 }
 0x8d3   : > { %v1878_v32 = vsub.f32 %v1822_v60, %v1845_v42  ;;  %v1832_v31 = vrot.slane %v1831_v12, 1  ;;  %v1848_v25 = vrot.slane %v1847_v51, 2  ;;  %v1852_v6 = vrot.slane %v4038_v41, 4 }
 0x8d4   : > { %v1839_v34 = vmax.f32 %v1837_v19, %v1838_v46  ;;  %v4048_v35 = vmul.f32 0.17677669, %v1813_v36  ;;  %v1816_v17 = vpop.xlane.xlu1 %1815 }
 0x8d5   : > { %v1888_v26 = vmul.f32 1.442695, %v1878_v32  ;;  %v1833_v28 = vmax.f32 %v1831_v12, %v1832_v31  ;;  %v1849_v8 = vmax.f32 %v1847_v51, %v1848_v25  ;;  %v1853_v38 = vmax.f32 %v4038_v41, %v1852_v6 }
 0x8d6   : > { %v1877_v55 = vsub.f32 %v4016_v50, %v1839_v34  ;;  %v1858_v60 = vrot.slane %v4048_v35, 4  ;;  %v4054_v58 = vmul.f32 0.17677669, %v1816_v17  ;;  %v1819_v45 = vpop.xlane.xlu0 %1818 }
 0x8d7   : > { %2972 = vpow2.f32 %v1888_v26  ;;  %v1876_v61 = vsub.f32 %v4018_v47, %v1833_v28  ;;  %v1850_v23 = vrot.slane %v1849_v8, 1  ;;  %v1854_v29 = vrot.slane %v1853_v38, 2 }
 0x8d8   : > { %v1886_v48 = vmul.f32 1.442695, %v1877_v55  ;;  %v1859_v50 = vmax.f32 %v4048_v35, %v1858_v60  ;;  %v1864_v53 = vrot.slane %v4054_v58, 4  ;;  %v4065_v52 = vmul.f32 0.17677669, %v1819_v45  ;;  %v2263_v59 = vpop.permute.xlu1 %2262 }
 0x8d9   : > { %v1884_v27 = vmul.f32 1.442695, %v1876_v61  ;;  %v1851_v62 = vmax.f32 %v1849_v8, %v1850_v23  ;;  %v1855_v63 = vmax.f32 %v1853_v38, %v1854_v29  ;;  %v2286_v10 = vmul.f32 %v2263_v59, %v2254_v20 }
 0x8da   : > { %2974 = vpow2.f32 %v1886_v48  ;;  %v1860_v47 = vrot.slane %v1859_v50, 2  ;;  %v1865_v40 = vmax.f32 %v4054_v58, %v1864_v53  ;;  %v1870_v19 = vrot.slane %v4065_v52, 4  ;;  %v2265_v0 = vpop.permute.xlu0 %2264 }
 0x8db   : > { %2976 = vpow2.f32 %v1884_v27  ;;  %v1879_v18 = vsub.f32 %v4026_v1, %v1851_v62  ;;  %v1856_v42 = vrot.slane %v1855_v63, 1  ;;  %v2294_v12 = vadd.f32 %v2286_v10, %v2246_v22 }
 0x8dc   : > { %v1861_v51 = vmax.f32 %v1859_v50, %v1860_v47  ;;  %v1866_v46 = vrot.slane %v1865_v40, 2  ;;  %v1871_v36 = vmax.f32 %v4065_v52, %v1870_v19  ;;  %v2287_v32 = vmul.f32 %v2265_v0, %v2255_v37  ;;  %v2267_v31 = vpop.permute.xlu1 %2266  ;;  %v4303_v47 = vld [vmem:[#allocation18_spill] sm:$0xff] }
 0x8dd   : > { %v1890_v20 = vmul.f32 1.442695, %v1879_v18  ;;  %v1857_v25 = vmax.f32 %v1855_v63, %v1856_v42  ;;  %2302 = vst.msk [vmem:[%s4075_s14] sm:$0xff] %vm425_vm0, %v2294_v12  ;;  %v2288_v1 = vmul.f32 %v2267_v31, %v2256_v15  ;;  %v2258_v22 = vsub.f32 1.0, %v4045_v7  ;;  %v4302_v15 = vld [vmem:[#allocation19_spill] sm:$0xff] }
 0x8de   : > { %v1862_v6 = vrot.slane %v1861_v51, 1  ;;  %v1867_v34 = vmax.f32 %v1865_v40, %v1866_v46  ;;  %v1872_v17 = vrot.slane %v1871_v36, 2  ;;  %v2295_v24 = vadd.f32 %v2287_v32, %v2247_v44  ;;  %v2271_v37 = vpop.permute.xlu0 %2270 }
 0x8df   : > { %2978 = vpow2.f32 %v1890_v20  ;;  %v1880_v26 = vsub.f32 %v4038_v41, %v1857_v25  ;;  %v2296_v28 = vadd.f32 %v2288_v1, %v4034_v14  ;;  %v2290_v8 = vmul.f32 %v2271_v37, %v2258_v22  ;;  %v4304_v20 = vld [vmem:[#allocation20_spill] sm:$0xff] }
 0x8e0   : > { %v1863_v38 = vmax.f32 %v1861_v51, %v1862_v6  ;;  %v1868_v55 = vrot.slane %v1867_v34, 1  ;;  %v1873_v60 = vmax.f32 %v1871_v36, %v1872_v17  ;;  %2303 = vst.msk [vmem:[%s4075_s14 + $0x8] sm:$0xff] %vm425_vm0, %v2295_v24  ;;  %v2269_v2 = vpop.permute.xlu1 %2268  ;;  %v2252_v7 = vmul.f32 %v4058_v56, %v4302_v15 }
 0x8e1   : > { %v4088_v45 = vpop.eup %2972  ;;  %v1892_v44 = vmul.f32 1.442695, %v1880_v26  ;;  %2304 = vst.msk [vmem:[%s4075_s14 + $0x10] sm:$0xff] %vm425_vm0, %v2296_v28  ;;  %v2298_v54 = vadd.f32 %v2290_v8, %v2250_v43  ;;  %v2289_v14 = vmul.f32 %v2269_v2, %v2257_v5  ;;  %v2260_v41 = vsub.f32 1.0, %v4058_v56 }
 0x8e2   : > { %v1912_v61 = vrot.slane %v4088_v45, 4  ;;  %v1881_v23 = vsub.f32 %v4048_v35, %v1863_v38  ;;  %v1869_v29 = vmax.f32 %v1867_v34, %v1868_v55  ;;  %v1874_v48 = vrot.slane %v1873_v60, 1  ;;  %v2275_v50 = vpop.permute.xlu0 %2274 }
 0x8e3   : > { %2980 = vpow2.f32 %v1892_v44  ;;  %2306 = vst.msk [vmem:[%s4075_s14 + $0x20] sm:$0xff] %vm425_vm0, %v2298_v54  ;;  %v2297_v53 = vadd.f32 %v2289_v14, %v4042_v33  ;;  %v2292_v59 = vmul.f32 %v2275_v50, %v2260_v41  ;;  %v2259_v43 = vsub.f32 1.0, %v4067_v21 }
 0x8e4   : > { %v4101_v4 = vpop.eup %2974  ;;  %v1913_v5 = vadd.f32 %v4088_v45, %v1912_v61  ;;  %v1894_v56 = vmul.f32 1.442695, %v1881_v23  ;;  %v1882_v35 = vsub.f32 %v4054_v58, %v1869_v29  ;;  %v1875_v27 = vmax.f32 %v1873_v60, %v1874_v48  ;;  %v2273_v62 = vpop.permute.xlu1 %2272 }
 0x8e5   : > { %v4105_v63 = vpop.eup %2976  ;;  %v1906_v10 = vrot.slane %v4101_v4, 4  ;;  %2305 = vst.msk [vmem:[%s4075_s14 + $0x18] sm:$0xff] %vm425_vm0, %v2297_v53  ;;  %v2300_v33 = vadd.f32 %v2292_v59, %v2252_v7  ;;  %v2251_v40 = vmul.f32 %v4067_v21, %v4303_v47  ;;  %v2291_v19 = vmul.f32 %v2273_v62, %v2259_v43 }
 0x8e6   : > { %v1900_v0 = vrot.slane %v4105_v63, 4  ;;  %2982 = vpow2.f32 %v1894_v56  ;;  %v1896_v18 = vmul.f32 1.442695, %v1882_v35  ;;  %v1883_v58 = vsub.f32 %v4065_v52, %v1875_v27 }
 0x8e7   : > { %v1907_v42 = vadd.f32 %v4101_v4, %v1906_v10  ;;  %2308 = vst.msk [vmem:[%s4075_s14 + $0x30] sm:$0xff] %vm425_vm0, %v2300_v33  ;;  %v2299_v12 = vadd.f32 %v2291_v19, %v2251_v40  ;;  %v2261_v51 = vsub.f32 1.0, %v4061_v30  ;;  %v1914_v46 = vrot.slane %v1913_v5, 2 }
 0x8e8   : > { %v1901_v36 = vadd.f32 %v4105_v63, %v1900_v0  ;;  %2984 = vpow2.f32 %v1896_v18  ;;  %v1898_v21 = vmul.f32 1.442695, %v1883_v58  ;;  %v2277_v32 = vpop.permute.xlu1 %2276  ;;  %v2253_v52 = vmul.f32 %v4061_v30, %v4304_v20 }
 0x8e9   : > { %v4119_v31 = vpop.eup %2978  ;;  %2307 = vst.msk [vmem:[%s4075_s14 + $0x28] sm:$0xff] %vm425_vm0, %v2299_v12  ;;  %v2293_v25 = vmul.f32 %v2277_v32, %v2261_v51  ;;  %v1915_v1 = vadd.f32 %v1914_v46, %v1913_v5  ;;  %v1908_v22 = vrot.slane %v1907_v42, 2 }
 0x8ea   : > { %v1918_v6 = vrot.slane %v4119_v31, 4  ;;  %2986 = vpow2.f32 %v1898_v21  ;;  %v1902_v34 = vrot.slane %v1901_v36, 2 }
 0x8eb   : > { %v2301_v17 = vadd.f32 %v2293_v25, %v2253_v52  ;;  %v1916_v24 = vrot.slane %v1915_v1, 1  ;;  %v1909_v37 = vadd.f32 %v1908_v22, %v1907_v42 }
 0x8ec   : > { %v1919_v26 = vadd.f32 %v4119_v31, %v1918_v6  ;;  %v1903_v28 = vadd.f32 %v1902_v34, %v1901_v36 }
 0x8ed   : > { %v4127_v8 = vpop.eup %2980  ;;  %2309 = vst.msk [vmem:[%s4075_s14 + $0x38] sm:$0xff] %vm425_vm0, %v2301_v17  ;;  %v1917_v38 = vadd.f32 %v1916_v24, %v1915_v1  ;;  %v1910_v55 = vrot.slane %v1909_v37, 1 }
 0x8ee   : > { %v1924_v30 = vrot.slane %v4127_v8, 4  ;;  %v1904_v60 = vrot.slane %v1903_v28, 1  ;;  %v1920_v2 = vrot.slane %v1919_v26, 2 }
 0x8ef   : > { %2988 = vrcp.f32 %v1917_v38  ;;  %v1911_v15 = vadd.f32 %v1910_v55, %v1909_v37 }
 0x8f0   : > { %v4132_v7 = vpop.eup %2982  ;;  %v1925_v44 = vadd.f32 %v4127_v8, %v1924_v30  ;;  %v1905_v54 = vadd.f32 %v1904_v60, %v1903_v28  ;;  %v1921_v14 = vadd.f32 %v1920_v2, %v1919_v26 }
 0x8f1   : > { %v1930_v41 = vrot.slane %v4132_v7, 4  ;;  %2990 = vrcp.f32 %v1911_v15 }
 0x8f2   : > { %v4136_v61 = vpop.eup %2984  ;;  %2992 = vrcp.f32 %v1905_v54  ;;  %v1922_v23 = vrot.slane %v1921_v14, 1  ;;  %v1926_v29 = vrot.slane %v1925_v44, 2 }
 0x8f3   : > { %v1931_v48 = vadd.f32 %v4132_v7, %v1930_v41  ;;  %v1936_v50 = vrot.slane %v4136_v61, 4 }
 0x8f4   : > { %v4140_v53 = vpop.eup %2986  ;;  %v1923_v59 = vadd.f32 %v1922_v23, %v1921_v14  ;;  %v1927_v43 = vadd.f32 %v1926_v29, %v1925_v44 }
 0x8f5   : > { %v1937_v5 = vadd.f32 %v4136_v61, %v1936_v50  ;;  %v1942_v56 = vrot.slane %v4140_v53, 4  ;;  %v1932_v35 = vrot.slane %v1931_v48, 2 }
 0x8f6   : > { %2994 = vrcp.f32 %v1923_v59  ;;  %v1928_v27 = vrot.slane %v1927_v43, 1 }
 0x8f7   : > { %v1943_v62 = vadd.f32 %v4140_v53, %v1942_v56  ;;  %v1938_v10 = vrot.slane %v1937_v5, 2  ;;  %v1933_v33 = vadd.f32 %v1932_v35, %v1931_v48 }
 0x8f8   : > { %v1929_v47 = vadd.f32 %v1928_v27, %v1927_v43 }
 0x8f9   : > { %v2989_v40 = vpop.eup %2988  ;;  %v1939_v19 = vadd.f32 %v1938_v10, %v1937_v5  ;;  %v1934_v0 = vrot.slane %v1933_v33, 1  ;;  %v1944_v18 = vrot.slane %v1943_v62, 2 }
 0x8fa   : > { %v1958_v58 = vmul.f32 %v2989_v40, %v4088_v45  ;;  %2996 = vrcp.f32 %v1929_v47 }
 0x8fb   : > { %v2991_v42 = vpop.eup %2990  ;;  %v1940_v12 = vrot.slane %v1939_v19, 1  ;;  %v1935_v51 = vadd.f32 %v1934_v0, %v1933_v33  ;;  %v1945_v46 = vadd.f32 %v1944_v18, %v1943_v62 }
 0x8fc   : > { %v2993_v36 = vpop.eup %2992  ;;  %v1966_v21 = vmul.f32 %v1958_v58, %v3923_v39  ;;  %v1957_v32 = vmul.f32 %v2991_v42, %v4101_v4 }
 0x8fd   : > { %v1956_v20 = vmul.f32 %v2993_v36, %v4105_v63  ;;  %v1941_v52 = vadd.f32 %v1940_v12, %v1939_v19  ;;  %2998 = vrcp.f32 %v1935_v51  ;;  %v1946_v25 = vrot.slane %v1945_v46, 1 }
 0x8fe   : > { %v1987_v1 = vsel %vm1972_vm11, %v1966_v21, 0.0  ;;  %v1965_v45 = vmul.f32 %v1957_v32, %v3915_v9 }
 0x8ff   : > { %v1988_v22 = vrot.slane %v1987_v1, 4  ;;  %v1964_v6 = vmul.f32 %v1956_v20, %v3913_v13  ;;  %3000 = vrcp.f32 %v1941_v52  ;;  %v1947_v34 = vadd.f32 %v1946_v25, %v1945_v46 }
 0x900   : > { %v2995_v17 = vpop.eup %2994  ;;  %v1980_v24 = vsel %vm1972_vm11, %v1965_v45, 0.0 }
 0x901   : > { %v1989_v39 = vadd.f32 %v1988_v22, %v1987_v1  ;;  %v1973_v4 = vsel %vm1972_vm11, %v1964_v6, 0.0  ;;  %v1959_v63 = vmul.f32 %v2995_v17, %v4119_v31  ;;  %v1981_v37 = vrot.slane %v1980_v24, 4 }
 0x902   : > { %v1974_v26 = vrot.slane %v1973_v4, 4  ;;  %3002 = vrcp.f32 %v1947_v34 }
 0x903   : > { %v1990_v28 = vrot.slane %v1989_v39, 2  ;;  %v1967_v38 = vmul.f32 %v1959_v63, %v3921_v16  ;;  %v1982_v9 = vadd.f32 %v1981_v37, %v1980_v24 }
 0x904   : > { %v2997_v55 = vpop.eup %2996  ;;  %v1975_v30 = vadd.f32 %v1974_v26, %v1973_v4 }
 0x905   : > { %v1991_v13 = vadd.f32 %v1990_v28, %v1989_v39  ;;  %v1994_v60 = vsel %vm1972_vm11, %v1967_v38, 0.0  ;;  %v1960_v2 = vmul.f32 %v2997_v55, %v4127_v8  ;;  %v1983_v41 = vrot.slane %v1982_v9, 2 }
 0x906   : > { %v1976_v15 = vrot.slane %v1975_v30, 2  ;;  %v1995_v44 = vrot.slane %v1994_v60, 4 }
 0x907   : > { %v2999_v54 = vpop.eup %2998  ;;  %v1992_v14 = vrot.slane %v1991_v13, 1  ;;  %v1968_v31 = vmul.f32 %v1960_v2, %v3934_v49  ;;  %v1984_v35 = vadd.f32 %v1983_v41, %v1982_v9 }
 0x908   : > { %v1977_v23 = vadd.f32 %v1976_v15, %v1975_v30  ;;  %v1996_v29 = vadd.f32 %v1995_v44, %v1994_v60  ;;  %v1961_v48 = vmul.f32 %v2999_v54, %v4132_v7 }
 0x909   : > { %v3001_v16 = vpop.eup %3000  ;;  %v1993_v50 = vadd.f32 %v1992_v14, %v1991_v13  ;;  %v2001_v59 = vsel %vm1972_vm11, %v1968_v31, 0.0  ;;  %v1985_v51 = vrot.slane %v1984_v35, 1 }
 0x90a   : > { %v1978_v43 = vrot.slane %v1977_v23, 1  ;;  %v1997_v5 = vrot.slane %v1996_v29, 2  ;;  %v2002_v56 = vrot.slane %v2001_v59, 4  ;;  %v1962_v8 = vmul.f32 %v3001_v16, %v4136_v61 }
 0x90b   : > { %2322 = vrot.lane.b32.xlu0 %v1993_v50, %s3202_s23  ;;  %v1969_v27 = vmul.f32 %v1961_v48, %v3939_v11  ;;  %v1986_v52 = vadd.f32 %v1985_v51, %v1984_v35 }
 0x90c   : > { %v3003_v49 = vpop.eup %3002  ;;  %v1979_v62 = vadd.f32 %v1978_v43, %v1977_v23  ;;  %v1998_v10 = vadd.f32 %v1997_v5, %v1996_v29  ;;  %v2003_v33 = vadd.f32 %v2002_v56, %v2001_v59  ;;  %v1970_v7 = vmul.f32 %v1962_v8, %v3943_v3 }
 0x90d   : > { %v2008_v47 = vsel %vm1972_vm11, %v1969_v27, 0.0  ;;  %v1963_v40 = vmul.f32 %v3003_v49, %v4140_v53 }
 0x90e   : > { %v1999_v19 = vrot.slane %v1998_v10, 1  ;;  %v2004_v0 = vrot.slane %v2003_v33, 2  ;;  %v2015_v61 = vsel %vm1972_vm11, %v1970_v7, 0.0  ;;  %v2009_v18 = vrot.slane %v2008_v47, 4 }
 0x90f   : > { %2318 = vrot.lane.b32.xlu0 %v1979_v62, %s3202_s23  ;;  %v2016_v11 = vrot.slane %v2015_v61, 4  ;;  %v1971_v58 = vmul.f32 %v1963_v40, %v3950_v57 }
 0x910   : > { %v2000_v42 = vadd.f32 %v1999_v19, %v1998_v10  ;;  %v2005_v12 = vadd.f32 %v2004_v0, %v2003_v33  ;;  %v2010_v3 = vadd.f32 %v2009_v18, %v2008_v47 }
 0x911   : > { %v2017_v46 = vadd.f32 %v2016_v11, %v2015_v61  ;;  %v2022_v36 = vsel %vm1972_vm11, %v1971_v58, 0.0 }
 0x912   : > { %2324 = vrot.lane.b32.xlu1 %v2000_v42, %s3202_s23  ;;  %v2006_v53 = vrot.slane %v2005_v12, 1  ;;  %v2011_v21 = vrot.slane %v2010_v3, 2  ;;  %v2023_v32 = vrot.slane %v2022_v36, 4 }
 0x913   : > { %v2018_v57 = vrot.slane %v2017_v46, 2 }
 0x914   : > { %v2007_v20 = vadd.f32 %v2006_v53, %v2005_v12  ;;  %v2012_v25 = vadd.f32 %v2011_v21, %v2010_v3  ;;  %v2024_v1 = vadd.f32 %v2023_v32, %v2022_v36 }
 0x915   : > { %v2019_v45 = vadd.f32 %v2018_v57, %v2017_v46 }
 0x916   : > { %3103 = shalt.err (!%p3100_p13)
}
 0x917   : > { %s3104_s12 = scalar_lea.hbm %s4176_s30, 1024  ;;  %s3108_s16 = scalar_lea.hbm %s4275_s6, 2048 }
 0x918   : > { %p3105_p6 = scmp.ne.s32.totalorder %s4176_s30, %s3104_s12  ;;  %p3109_p5 = scmp.lt.u32.totalorder %s4176_s30, %s4275_s6 }
 0x919   : > { %p3110_p8 = scmp.lt.u32.totalorder %s3108_s16, %s3104_s12  ;;  %p3112_p0 = scmp.lt.u32.totalorder %s3104_s12, %s4176_s30 }
 0x91a   : > { %p3106_p10 = pnand %p3105_p6, %p4305_p1 }
 0x91b   : > { %p3111_p11 = por %p3110_p8, %p3109_p5 }
 0x91c   : > { %p3107_p4 = pneg %p3106_p10 }
 0x91d   : > { %p3113_p3 = por %p3112_p0, %p3111_p11 }
 0x91f   : > { %p3114_p7 = pnand %p3113_p3, %p3107_p4 }
 0x921   : > { %3117 = shalt.err (!%p3114_p7)
}
 0x922   : > { %s3209_s11 = smov 128   ;;  %s3210_s10 = smov 8   ;;  %2326 = vrot.lane.b32.xlu0 %v2007_v20, %s3202_s23  ;;  %2320 = vrot.lane.b32.xlu1 %v1986_v52, %s3202_s23  ;;  %v2013_v22 = vrot.slane %v2012_v25, 1  ;;  %v2025_v6 = vrot.slane %v2024_v1, 2  ;;  %v2020_v34 = vrot.slane %v2019_v45, 1  ;;  %vm2342_vm12 = vcmask 253952  }
 0x923   : > { %2758 = dma.vmem_to_hbm [thread:$0]  (%p4305_p1), %s4179_s9, 1024, %s4176_s30, %s2352_s20, %s3209_s11, %s3209_s11, %s3210_s10  }
 0x924   : > { %v2014_v17 = vadd.f32 %v2013_v22, %v2012_v25  ;;  %v2026_v24 = vadd.f32 %v2025_v6, %v2024_v1  ;;  %v2021_v39 = vadd.f32 %v2020_v34, %v2019_v45  ;;  %s2547_s30 = sshll.u32 %s3426_s18, 3  ;;  %s2622_s20 = sshll.u32 %s3275_s28, 7 }
 0x925   : > { %s362_s9 = scalar_lea.vmem [#allocation10], %s2547_s30  ;;  %s4224_s14 = scalar_lea.hbm %s4276_s7, %s2622_s20 }
 0x926   : > { %2328 = vrot.lane.b32.xlu1 %v2014_v17, %s3202_s23  ;;  %v2027_v4 = vrot.slane %v2026_v24, 1  ;;  %2330 = vrot.lane.b32.xlu0 %v2021_v39, %s3202_s23  ;;  %s2357_s19 = scalar_lea.sflag [#allocation11], %s3426_s18  ;;  %s3211_s16 = smov [#allocation10]  }
 0x927   : > { %s3122_s21 = sshll.u32 %s3211_s16, 4  ;;  %s3123_s21 = int_to_ptr.vmem [resolvable:$false] %s3122_s21 }
 0x928   : > { %v2028_v63 = vadd.f32 %v2027_v4, %v2026_v24  ;;  %s3124_s22 = scalar_lea.vmem %s3123_s21, 256 }
 0x92a   : > { %2332 = vrot.lane.b32.xlu1 %v2028_v63, %s3202_s23  ;;  %s2386_s23 = sshll.u32 %s362_s9, 4  ;;  %s4217_s23 = int_to_ptr.vmem [resolvable:$true] %s2386_s23 }
 0x92b   : > { %s3118_s28 = scalar_lea.vmem %s4217_s23, 128  ;;  %p3125_p13 = scmp.lt.s32.totalorder %s4217_s23, %s3123_s21 }
 0x92c   : > { %p3119_p9 = scmp.ne.s32.totalorder %s4217_s23, %s3118_s28  ;;  %p3126_p6 = scmp.lt.s32.totalorder %s3124_s22, %s3118_s28 }
 0x92e   : > { %p3120_p12 = pnand %p3119_p9, %p4305_p1  ;;  %p3127_p10 = por %p3126_p6, %p3125_p13 }
 0x930   : > { %p3121_p2 = pneg %p3120_p12 }
 0x932   : > { %p3128_p4 = pnand %p3127_p10, %p3121_p2 }
 0x97d   : > { %v2323_v37 = vpop.permute.xlu0 %2322 }
 0x97e   : > { %2345 = vst.msk [vmem:[%s362_s9 + $0x2] sm:$0x1] %vm2342_vm12, %v2323_v37 }
 0x981   : > { %v2319_v26 = vpop.permute.xlu0 %2318 }
 0x982   : > { %2343 = vst.msk [vmem:[%s362_s9] sm:$0x1] %vm2342_vm12, %v2319_v26 }
 0x984   : > { %v2325_v28 = vpop.permute.xlu1 %2324 }
 0x985   : > { %2346 = vst.msk [vmem:[%s362_s9 + $0x3] sm:$0x1] %vm2342_vm12, %v2325_v28 }
 0x994   : > { %v2327_v38 = vpop.permute.xlu0 %2326  ;;  %v2321_v9 = vpop.permute.xlu1 %2320 }
 0x995   : > { %2347 = vst.msk [vmem:[%s362_s9 + $0x4] sm:$0x1] %vm2342_vm12, %v2327_v38  ;;  %2344 = vst.msk [vmem:[%s362_s9 + $0x1] sm:$0x1] %vm2342_vm12, %v2321_v9 }
 0x998   : > { %v2329_v55 = vpop.permute.xlu1 %2328  ;;  %v2331_v30 = vpop.permute.xlu0 %2330 }
 0x999   : > { %2348 = vst.msk [vmem:[%s362_s9 + $0x5] sm:$0x1] %vm2342_vm12, %v2329_v55  ;;  %2349 = vst.msk [vmem:[%s362_s9 + $0x6] sm:$0x1] %vm2342_vm12, %v2331_v30 }
 0x99c   : > { %v2333_v13 = vpop.permute.xlu1 %2332 }
 0x99d   : > { %2350 = vst.msk [vmem:[%s362_s9 + $0x7] sm:$0x1] %vm2342_vm12, %v2333_v13 }
 0x99e   : > { %3131 = shalt.err (!%p3128_p4)
}
 0x99f   : > { %s3132_s11 = scalar_lea.hbm %s4224_s14, 128  ;;  %s3136_s9 = scalar_lea.hbm %s4276_s7, 256 }
 0x9a0   : > { %p3133_p5 = scmp.ne.s32.totalorder %s4224_s14, %s3132_s11  ;;  %p3137_p0 = scmp.lt.u32.totalorder %s4224_s14, %s4276_s7 }
 0x9a1   : > { %p3138_p3 = scmp.lt.u32.totalorder %s3136_s9, %s3132_s11  ;;  %p3140_p9 = scmp.lt.u32.totalorder %s3132_s11, %s4224_s14 }
 0x9a2   : > { %p3134_p8 = pnand %p3133_p5, %p4305_p1 }
 0x9a3   : > { %p3139_p7 = por %p3138_p3, %p3137_p0 }
 0x9a4   : > { %p3135_p11 = pneg %p3134_p8 }
 0x9a5   : > { %p3141_p12 = por %p3140_p9, %p3139_p7 }
 0x9a7   : > { %p3142_p2 = pnand %p3141_p12, %p3135_p11 }
 0x9a9   : > { %3145 = shalt.err (!%p3142_p2)
}
 0x9aa   : > { %s3212_s12 = smov 16   ;;  %s3213_s28 = smov 1  }
 0x9ab   : > { %2759 = dma.vmem_to_hbm [thread:$0]  (%p4305_p1), %s4217_s23, 128, %s4224_s14, %s2357_s19, %s3212_s12, %s3212_s12, %s3213_s28  }
 0x9ac PF: > { %s2401_s16 = sand.u32 1, %s3180_s24   ;;  %p4306_p13 = scmp.ne.s32.totalorder %s4286_s8, 0 }
 0x9ad   : > { %p4307_p6 = scmp.ge.s32.totalorder %s3192_s27, 2  ;;  %s2402_s21 = scalar_lea.sflag [#allocation5], %s2401_s16 }
 0x9af   : > { %p2774_p10 = pnand %p4307_p6, %p4306_p13 }
 0x9b1   : > { %3171 = dma.done.wait (!%p2774_p10), %s2402_s21, 1024  }
 0x9b2   : > { %3173 = vsyncadd (!%p2774_p10), %s2402_s21, 4294966272  ;;  %s2411_s22 = scalar_lea.sflag [#allocation11], %s2401_s16 }
 0x9b3   : > { %3175 = dma.done.wait (!%p2774_p10), %s2411_s22, 128  }
 0x9b4   : > { %3177 = vsyncadd (!%p2774_p10), %s2411_s22, 4294967168  ;;  %p25_p1 = scmp.ge.s32.totalorder %s3364_s29, 4   ;;  %s4308_s24 = smov %s3184_s25 }
 0x9b5   : > { %s4309_s25 = smov %s3188_s26  ;;  %s4310_s26 = smov %s3380_s15 }
 0x9b6   : > { %s4311_s27 = smov %s3364_s29  ;;  %27 = sbr.rel (!%p25_p1) target bundleno = 8 (0x8), region = 120 }
 0x9bd   :  { %2416 = vsyncpa [#allocation4], 1 }
 0x9be   :  { %2418 = vsyncpa [#allocation4 + $0x1], 1 }
 0x9bf   :  { %2419 = vsyncpa [#allocation7], 1 }
 0x9c0   :  { %2420 = vsyncpa [#allocation5], 1 }
 0x9c1   :  { %2422 = vsyncpa [#allocation5 + $0x1], 1 }
 0x9c2   :  { %2423 = vsyncpa [#allocation11], 1 }
 0x9c3   :  { %2425 = vsyncpa [#allocation11 + $0x1], 1 }

</bundles_post_ra>
